<compile_context>
chip_gen: v6e
topology: v6e:2x2x1
jax: 0.10.0
libtpu: 0.0.40
codegen_flags: <defaults>
</compile_context>

<pallas_src>
import jax
import jax.numpy as jnp
from jax import lax
from jax.experimental import pallas as pl
from jax.experimental.pallas import tpu as pltpu


def lstm_kernel(x_ref, wih_ref, whh_ref, b_ref, fcw_ref, fcb_ref,
                out_ref, xw_sc):
    """Single-invocation LSTM.

    x_ref   : (T*B, E)  time-major embedded inputs (row = t*B + b).
    wih_ref : (E, 4H)   input->gates weights (gate order i, f, g, o).
    whh_ref : (H, 4H)   hidden->gates weights.
    b_ref   : (1, 4H)   combined bias (b_ih + b_hh).
    fcw_ref : (H, H)    fc weight (transposed vs PyTorch).
    fcb_ref : (1, H)    fc bias.
    out_ref : (B, H)    fc(last hidden state).
    xw_sc   : (T*B, 4H) VMEM scratch: X @ W_ih + b for all timesteps.
    """
    B, H = out_ref.shape
    TB = x_ref.shape[0]
    T = TB // B

    # Phase 1: one big M = T*B input-projection matmul; bias folded in here so
    # the (1,4H)->(.,4H) broadcast is NOT repeated inside the time loop.
    xw_sc[...] = (
        jnp.dot(x_ref[...], wih_ref[...], preferred_element_type=jnp.float32)
        + b_ref[...]
    )

    def sig(z):
        # sigmoid(z) = 0.5 * tanh(0.5*z) + 0.5  -> a single EUP op per element.
        return 0.5 * jnp.tanh(0.5 * z) + 0.5

    # Phase 2: serial recurrence, fully unrolled inside the kernel.
    def step(t, carry):
        h, c = carry
        row = pl.multiple_of(t * B, B)
        gates = xw_sc[pl.ds(row, B), :] + jnp.dot(
            h, whh_ref[...], preferred_element_type=jnp.float32)   # (B, 4H)
        if_g = sig(gates[:, 0:2 * H])            # i and f gates in one slab
        g_g = jnp.tanh(gates[:, 2 * H:3 * H])
        o_g = sig(gates[:, 3 * H:4 * H])
        i_g = if_g[:, 0:H]
        f_g = if_g[:, H:2 * H]
        c_new = f_g * c + i_g * g_g
        h_new = o_g * jnp.tanh(c_new)
        return h_new, c_new

    h0 = jnp.zeros((B, H), jnp.float32)
    c0 = jnp.zeros((B, H), jnp.float32)
    h_last, _ = lax.fori_loop(0, T, step, (h0, c0), unroll=True)

    # Final Linear head on the last hidden state.
    out_ref[...] = (
        jnp.dot(h_last, fcw_ref[...], preferred_element_type=jnp.float32)
        + fcb_ref[...]
    ).astype(out_ref.dtype)


def lstm_model_forward(x_ids, emb_table, w_ih, w_hh, b, fc_w, fc_b):
    """x_ids: (B, T) int32.  Returns (B, H) float32."""
    B, T = x_ids.shape
    E = emb_table.shape[1]
    H = w_hh.shape[0]

    # (8,128) tiling requirements of the BlockSpecs / layouts used below.
    assert B % 8 == 0, "batch must be a multiple of 8 (sublane tiling)"
    assert E % 128 == 0 and H % 128 == 0, "E and H must be multiples of 128"

    # Embedding lookup (glue), gathered directly in time-major flat order:
    # row index t*B + b corresponds to token (b, t).
    flat_ids = x_ids.T.reshape(-1)                    # (T*B,) time-major
    x_tm = jnp.take(emb_table, flat_ids, axis=0)      # (T*B, E)

    b2 = b.reshape(1, 4 * H)
    fcb2 = fc_b.reshape(1, H)

    grid_spec = pltpu.PrefetchScalarGridSpec(
        num_scalar_prefetch=0,
        grid=(1,),                                    # whole seq in one step
        in_specs=[
            pl.BlockSpec((T * B, E), lambda i: (0, 0)),       # embedded inputs
            pl.BlockSpec((E, 4 * H), lambda i: (0, 0)),       # W_ih
            pl.BlockSpec((H, 4 * H), lambda i: (0, 0)),       # W_hh
            pl.BlockSpec((1, 4 * H), lambda i: (0, 0)),       # bias
            pl.BlockSpec((H, H), lambda i: (0, 0)),           # fc weight
            pl.BlockSpec((1, H), lambda i: (0, 0)),           # fc bias
        ],
        out_specs=pl.BlockSpec((B, H), lambda i: (0, 0)),
        scratch_shapes=[
            pltpu.VMEM((T * B, 4 * H), jnp.float32),          # X @ W_ih + b
        ],
    )

    return pl.pallas_call(
        lstm_kernel,
        out_shape=jax.ShapeDtypeStruct((B, H), jnp.float32),
        grid_spec=grid_spec,
        compiler_params=pltpu.CompilerParams(
            dimension_semantics=("arbitrary",)),
    )(x_tm, w_ih, w_hh, b2, fc_w, fcb2)


def lstm_model_reference(x_ids, emb_table, w_ih, w_hh, b, fc_w, fc_b):
    embeds = jnp.take(emb_table, x_ids, axis=0)            # (B, T, E)
    B = x_ids.shape[0]
    H = w_hh.shape[0]

    def step(carry, x_t):
        h, c = carry
        gates = x_t @ w_ih + h @ w_hh + b
        i_g, f_g, g_g, o_g = jnp.split(gates, 4, axis=-1)
        i_g = jax.nn.sigmoid(i_g)
        f_g = jax.nn.sigmoid(f_g)
        g_g = jnp.tanh(g_g)
        o_g = jax.nn.sigmoid(o_g)
        c = f_g * c + i_g * g_g
        h = o_g * jnp.tanh(c)
        return (h, c), None

    h0 = jnp.zeros((B, H), jnp.float32)
    c0 = jnp.zeros((B, H), jnp.float32)
    (h, _), _ = jax.lax.scan(step, (h0, c0), jnp.transpose(embeds, (1, 0, 2)))
    return h @ fc_w + fc_b


if __name__ == "__main__":
    # Small, deterministic synthetic setup consistent with the module.
    vocab_size = 1000
    embedding_dim = 128
    hidden_dim = 128
    B, T = 8, 8

    key = jax.random.PRNGKey(0)
    k_emb, k_wih, k_whh, k_bih, k_bhh, k_fcw, k_fcb, k_ids = jax.random.split(key, 8)

    scale = 1.0 / jnp.sqrt(hidden_dim)
    emb_table = jax.random.normal(k_emb, (vocab_size, embedding_dim), jnp.float32)
    # PyTorch stores weight_ih as (4H, E); we keep the transposed (E, 4H) layout.
    w_ih = jax.random.uniform(k_wih, (embedding_dim, 4 * hidden_dim),
                              jnp.float32, -scale, scale)
    w_hh = jax.random.uniform(k_whh, (hidden_dim, 4 * hidden_dim),
                              jnp.float32, -scale, scale)
    b_ih = jax.random.uniform(k_bih, (4 * hidden_dim,), jnp.float32, -scale, scale)
    b_hh = jax.random.uniform(k_bhh, (4 * hidden_dim,), jnp.float32, -scale, scale)
    b = b_ih + b_hh
    fc_w = jax.random.uniform(k_fcw, (hidden_dim, hidden_dim),
                              jnp.float32, -scale, scale)
    fc_b = jax.random.uniform(k_fcb, (hidden_dim,), jnp.float32, -scale, scale)

    x_ids = jax.random.randint(k_ids, (B, T), 0, vocab_size, jnp.int32)

    out = lstm_model_forward(x_ids, emb_table, w_ih, w_hh, b, fc_w, fc_b)
    out = jax.block_until_ready(out)

    ref = lstm_model_reference(x_ids, emb_table, w_ih, w_hh, b, fc_w, fc_b)
    assert out.shape == (B, hidden_dim)
    assert jnp.allclose(out, ref, atol=2e-4, rtol=2e-4), "mismatch vs reference"

    print("KERNEL_OK")
</pallas_src>

<mosaic_0001>
module attributes {stable_mosaic.version = 11 : i64} {
  func.func @lstm_kernel(%arg0: i32, %arg1: memref<64x128xf32, #tpu.memory_space<vmem>>, %arg2: memref<128x512xf32, #tpu.memory_space<vmem>>, %arg3: memref<128x512xf32, #tpu.memory_space<vmem>>, %arg4: memref<1x512xf32, #tpu.memory_space<vmem>>, %arg5: memref<128x128xf32, #tpu.memory_space<vmem>>, %arg6: memref<1x128xf32, #tpu.memory_space<vmem>>, %arg7: memref<8x128xf32, #tpu.memory_space<vmem>>, %arg8: memref<64x512xf32, #tpu.memory_space<vmem>>) attributes {dimension_semantics = [#tpu.dimension_semantics<arbitrary>], iteration_bounds = array<i64: 1>, scalar_prefetch = 0 : i64, scratch_operands = 1 : i64, tpu.core_type = #tpu.core_type<tc>, window_params = [{pipeline_mode = #tpu.pipeline_mode<synchronous>, transform_indices = @transform_0, window_bounds = array<i64: 64, 128>}, {pipeline_mode = #tpu.pipeline_mode<synchronous>, transform_indices = @transform_1, window_bounds = array<i64: 128, 512>}, {pipeline_mode = #tpu.pipeline_mode<synchronous>, transform_indices = @transform_2, window_bounds = array<i64: 128, 512>}, {pipeline_mode = #tpu.pipeline_mode<synchronous>, transform_indices = @transform_3, window_bounds = array<i64: 1, 512>}, {pipeline_mode = #tpu.pipeline_mode<synchronous>, transform_indices = @transform_4, window_bounds = array<i64: 128, 128>}, {pipeline_mode = #tpu.pipeline_mode<synchronous>, transform_indices = @transform_5, window_bounds = array<i64: 1, 128>}, {pipeline_mode = #tpu.pipeline_mode<synchronous>, transform_indices = @transform_6, window_bounds = array<i64: 8, 128>}]} {
    %c0 = arith.constant 0 : index
    %c0_0 = arith.constant 0 : index
    %0 = vector.load %arg1[%c0, %c0_0] : memref<64x128xf32, #tpu.memory_space<vmem>>, vector<64x128xf32>
    %c0_1 = arith.constant 0 : index
    %c0_2 = arith.constant 0 : index
    %1 = vector.load %arg2[%c0_1, %c0_2] : memref<128x512xf32, #tpu.memory_space<vmem>>, vector<128x512xf32>
    %cst = arith.constant dense<0.000000e+00> : vector<64x512xf32>
    %2 = tpu.matmul %0, %1, %cst {dimension_numbers = #tpu.dot_dimension_numbers<[1], [0], [0], [1], [0, 0, 1, 1], [], []>} : vector<64x128xf32>, vector<128x512xf32>, vector<64x512xf32> -> vector<64x512xf32>
    %c0_3 = arith.constant 0 : index
    %c0_4 = arith.constant 0 : index
    %3 = vector.load %arg4[%c0_3, %c0_4] : memref<1x512xf32, #tpu.memory_space<vmem>>, vector<1x512xf32>
    %4 = vector.broadcast %3 : vector<1x512xf32> to vector<64x512xf32>
    %5 = arith.addf %2, %4 : vector<64x512xf32>
    %c0_5 = arith.constant 0 : index
    %c0_6 = arith.constant 0 : index
    %6 = vector.load %arg8[%c0_5, %c0_6] : memref<64x512xf32, #tpu.memory_space<vmem>>, vector<64x512xf32>
    tpu.vector_store %arg8[%c0_5, %c0_6], %5 {strides = array<i32>} : memref<64x512xf32, #tpu.memory_space<vmem>>, vector<64x512xf32>,
    %cst_7 = arith.constant 0.000000e+00 : f32
    %7 = vector.broadcast %cst_7 : f32 to vector<8x128xf32>
    %cst_8 = arith.constant 0.000000e+00 : f32
    %8 = vector.broadcast %cst_8 : f32 to vector<8x128xf32>
    %c0_i32 = arith.constant 0 : i32
    %c8_i32 = arith.constant 8 : i32
    %9 = arith.muli %c0_i32, %c8_i32 : i32
    %10 = tpu.assume_multiple %9, 8 : i32
    %11 = arith.index_cast %10 : i32 to index
    %c0_9 = arith.constant 0 : index
    %12 = vector.load %arg8[%11, %c0_9] : memref<64x512xf32, #tpu.memory_space<vmem>>, vector<8x512xf32>
    %c0_10 = arith.constant 0 : index
    %c0_11 = arith.constant 0 : index
    %13 = vector.load %arg3[%c0_10, %c0_11] : memref<128x512xf32, #tpu.memory_space<vmem>>, vector<128x512xf32>
    %cst_12 = arith.constant dense<0.000000e+00> : vector<8x512xf32>
    %14 = tpu.matmul %7, %13, %cst_12 {dimension_numbers = #tpu.dot_dimension_numbers<[1], [0], [0], [1], [0, 0, 1, 1], [], []>} : vector<8x128xf32>, vector<128x512xf32>, vector<8x512xf32> -> vector<8x512xf32>
    %15 = arith.addf %12, %14 : vector<8x512xf32>
    %16 = vector.extract_strided_slice %15 {offsets = [0, 0], sizes = [8, 256], strides = [1, 1]} : vector<8x512xf32> to vector<8x256xf32>
    %cst_13 = arith.constant 5.000000e-01 : f32
    %17 = vector.broadcast %cst_13 : f32 to vector<8x256xf32>
    %18 = arith.mulf %17, %16 : vector<8x256xf32>
    %19 = math.tanh %18 : vector<8x256xf32>
    %cst_14 = arith.constant 5.000000e-01 : f32
    %20 = vector.broadcast %cst_14 : f32 to vector<8x256xf32>
    %21 = arith.mulf %20, %19 : vector<8x256xf32>
    %cst_15 = arith.constant 5.000000e-01 : f32
    %22 = vector.broadcast %cst_15 : f32 to vector<8x256xf32>
    %23 = arith.addf %21, %22 : vector<8x256xf32>
    %24 = vector.extract_strided_slice %15 {offsets = [0, 256], sizes = [8, 128], strides = [1, 1]} : vector<8x512xf32> to vector<8x128xf32>
    %25 = math.tanh %24 : vector<8x128xf32>
    %26 = vector.extract_strided_slice %15 {offsets = [0, 384], sizes = [8, 128], strides = [1, 1]} : vector<8x512xf32> to vector<8x128xf32>
    %cst_16 = arith.constant 5.000000e-01 : f32
    %27 = vector.broadcast %cst_16 : f32 to vector<8x128xf32>
    %28 = arith.mulf %27, %26 : vector<8x128xf32>
    %29 = math.tanh %28 : vector<8x128xf32>
    %cst_17 = arith.constant 5.000000e-01 : f32
    %30 = vector.broadcast %cst_17 : f32 to vector<8x128xf32>
    %31 = arith.mulf %30, %29 : vector<8x128xf32>
    %cst_18 = arith.constant 5.000000e-01 : f32
    %32 = vector.broadcast %cst_18 : f32 to vector<8x128xf32>
    %33 = arith.addf %31, %32 : vector<8x128xf32>
    %34 = vector.extract_strided_slice %23 {offsets = [0, 0], sizes = [8, 128], strides = [1, 1]} : vector<8x256xf32> to vector<8x128xf32>
    %35 = vector.extract_strided_slice %23 {offsets = [0, 128], sizes = [8, 128], strides = [1, 1]} : vector<8x256xf32> to vector<8x128xf32>
    %36 = arith.mulf %35, %8 : vector<8x128xf32>
    %37 = arith.mulf %34, %25 : vector<8x128xf32>
    %38 = arith.addf %36, %37 : vector<8x128xf32>
    %39 = math.tanh %38 : vector<8x128xf32>
    %40 = arith.mulf %33, %39 : vector<8x128xf32>
    %c1_i32 = arith.constant 1 : i32
    %c8_i32_19 = arith.constant 8 : i32
    %41 = arith.muli %c1_i32, %c8_i32_19 : i32
    %42 = tpu.assume_multiple %41, 8 : i32
    %43 = arith.index_cast %42 : i32 to index
    %c0_20 = arith.constant 0 : index
    %44 = vector.load %arg8[%43, %c0_20] : memref<64x512xf32, #tpu.memory_space<vmem>>, vector<8x512xf32>
    %c0_21 = arith.constant 0 : index
    %c0_22 = arith.constant 0 : index
    %45 = vector.load %arg3[%c0_21, %c0_22] : memref<128x512xf32, #tpu.memory_space<vmem>>, vector<128x512xf32>
    %cst_23 = arith.constant dense<0.000000e+00> : vector<8x512xf32>
    %46 = tpu.matmul %40, %45, %cst_23 {dimension_numbers = #tpu.dot_dimension_numbers<[1], [0], [0], [1], [0, 0, 1, 1], [], []>} : vector<8x128xf32>, vector<128x512xf32>, vector<8x512xf32> -> vector<8x512xf32>
    %47 = arith.addf %44, %46 : vector<8x512xf32>
    %48 = vector.extract_strided_slice %47 {offsets = [0, 0], sizes = [8, 256], strides = [1, 1]} : vector<8x512xf32> to vector<8x256xf32>
    %cst_24 = arith.constant 5.000000e-01 : f32
    %49 = vector.broadcast %cst_24 : f32 to vector<8x256xf32>
    %50 = arith.mulf %49, %48 : vector<8x256xf32>
    %51 = math.tanh %50 : vector<8x256xf32>
    %cst_25 = arith.constant 5.000000e-01 : f32
    %52 = vector.broadcast %cst_25 : f32 to vector<8x256xf32>
    %53 = arith.mulf %52, %51 : vector<8x256xf32>
    %cst_26 = arith.constant 5.000000e-01 : f32
    %54 = vector.broadcast %cst_26 : f32 to vector<8x256xf32>
    %55 = arith.addf %53, %54 : vector<8x256xf32>
    %56 = vector.extract_strided_slice %47 {offsets = [0, 256], sizes = [8, 128], strides = [1, 1]} : vector<8x512xf32> to vector<8x128xf32>
    %57 = math.tanh %56 : vector<8x128xf32>
    %58 = vector.extract_strided_slice %47 {offsets = [0, 384], sizes = [8, 128], strides = [1, 1]} : vector<8x512xf32> to vector<8x128xf32>
    %cst_27 = arith.constant 5.000000e-01 : f32
    %59 = vector.broadcast %cst_27 : f32 to vector<8x128xf32>
    %60 = arith.mulf %59, %58 : vector<8x128xf32>
    %61 = math.tanh %60 : vector<8x128xf32>
    %cst_28 = arith.constant 5.000000e-01 : f32
    %62 = vector.broadcast %cst_28 : f32 to vector<8x128xf32>
    %63 = arith.mulf %62, %61 : vector<8x128xf32>
    %cst_29 = arith.constant 5.000000e-01 : f32
    %64 = vector.broadcast %cst_29 : f32 to vector<8x128xf32>
    %65 = arith.addf %63, %64 : vector<8x128xf32>
    %66 = vector.extract_strided_slice %55 {offsets = [0, 0], sizes = [8, 128], strides = [1, 1]} : vector<8x256xf32> to vector<8x128xf32>
    %67 = vector.extract_strided_slice %55 {offsets = [0, 128], sizes = [8, 128], strides = [1, 1]} : vector<8x256xf32> to vector<8x128xf32>
    %68 = arith.mulf %67, %38 : vector<8x128xf32>
    %69 = arith.mulf %66, %57 : vector<8x128xf32>
    %70 = arith.addf %68, %69 : vector<8x128xf32>
    %71 = math.tanh %70 : vector<8x128xf32>
    %72 = arith.mulf %65, %71 : vector<8x128xf32>
    %c2_i32 = arith.constant 2 : i32
    %c8_i32_30 = arith.constant 8 : i32
    %73 = arith.muli %c2_i32, %c8_i32_30 : i32
    %74 = tpu.assume_multiple %73, 8 : i32
    %75 = arith.index_cast %74 : i32 to index
    %c0_31 = arith.constant 0 : index
    %76 = vector.load %arg8[%75, %c0_31] : memref<64x512xf32, #tpu.memory_space<vmem>>, vector<8x512xf32>
    %c0_32 = arith.constant 0 : index
    %c0_33 = arith.constant 0 : index
    %77 = vector.load %arg3[%c0_32, %c0_33] : memref<128x512xf32, #tpu.memory_space<vmem>>, vector<128x512xf32>
    %cst_34 = arith.constant dense<0.000000e+00> : vector<8x512xf32>
    %78 = tpu.matmul %72, %77, %cst_34 {dimension_numbers = #tpu.dot_dimension_numbers<[1], [0], [0], [1], [0, 0, 1, 1], [], []>} : vector<8x128xf32>, vector<128x512xf32>, vector<8x512xf32> -> vector<8x512xf32>
    %79 = arith.addf %76, %78 : vector<8x512xf32>
    %80 = vector.extract_strided_slice %79 {offsets = [0, 0], sizes = [8, 256], strides = [1, 1]} : vector<8x512xf32> to vector<8x256xf32>
    %cst_35 = arith.constant 5.000000e-01 : f32
    %81 = vector.broadcast %cst_35 : f32 to vector<8x256xf32>
    %82 = arith.mulf %81, %80 : vector<8x256xf32>
    %83 = math.tanh %82 : vector<8x256xf32>
    %cst_36 = arith.constant 5.000000e-01 : f32
    %84 = vector.broadcast %cst_36 : f32 to vector<8x256xf32>
    %85 = arith.mulf %84, %83 : vector<8x256xf32>
    %cst_37 = arith.constant 5.000000e-01 : f32
    %86 = vector.broadcast %cst_37 : f32 to vector<8x256xf32>
    %87 = arith.addf %85, %86 : vector<8x256xf32>
    %88 = vector.extract_strided_slice %79 {offsets = [0, 256], sizes = [8, 128], strides = [1, 1]} : vector<8x512xf32> to vector<8x128xf32>
    %89 = math.tanh %88 : vector<8x128xf32>
    %90 = vector.extract_strided_slice %79 {offsets = [0, 384], sizes = [8, 128], strides = [1, 1]} : vector<8x512xf32> to vector<8x128xf32>
    %cst_38 = arith.constant 5.000000e-01 : f32
    %91 = vector.broadcast %cst_38 : f32 to vector<8x128xf32>
    %92 = arith.mulf %91, %90 : vector<8x128xf32>
    %93 = math.tanh %92 : vector<8x128xf32>
    %cst_39 = arith.constant 5.000000e-01 : f32
    %94 = vector.broadcast %cst_39 : f32 to vector<8x128xf32>
    %95 = arith.mulf %94, %93 : vector<8x128xf32>
    %cst_40 = arith.constant 5.000000e-01 : f32
    %96 = vector.broadcast %cst_40 : f32 to vector<8x128xf32>
    %97 = arith.addf %95, %96 : vector<8x128xf32>
    %98 = vector.extract_strided_slice %87 {offsets = [0, 0], sizes = [8, 128], strides = [1, 1]} : vector<8x256xf32> to vector<8x128xf32>
    %99 = vector.extract_strided_slice %87 {offsets = [0, 128], sizes = [8, 128], strides = [1, 1]} : vector<8x256xf32> to vector<8x128xf32>
    %100 = arith.mulf %99, %70 : vector<8x128xf32>
    %101 = arith.mulf %98, %89 : vector<8x128xf32>
    %102 = arith.addf %100, %101 : vector<8x128xf32>
    %103 = math.tanh %102 : vector<8x128xf32>
    %104 = arith.mulf %97, %103 : vector<8x128xf32>
    %c3_i32 = arith.constant 3 : i32
    %c8_i32_41 = arith.constant 8 : i32
    %105 = arith.muli %c3_i32, %c8_i32_41 : i32
    %106 = tpu.assume_multiple %105, 8 : i32
    %107 = arith.index_cast %106 : i32 to index
    %c0_42 = arith.constant 0 : index
    %108 = vector.load %arg8[%107, %c0_42] : memref<64x512xf32, #tpu.memory_space<vmem>>, vector<8x512xf32>
    %c0_43 = arith.constant 0 : index
    %c0_44 = arith.constant 0 : index
    %109 = vector.load %arg3[%c0_43, %c0_44] : memref<128x512xf32, #tpu.memory_space<vmem>>, vector<128x512xf32>
    %cst_45 = arith.constant dense<0.000000e+00> : vector<8x512xf32>
    %110 = tpu.matmul %104, %109, %cst_45 {dimension_numbers = #tpu.dot_dimension_numbers<[1], [0], [0], [1], [0, 0, 1, 1], [], []>} : vector<8x128xf32>, vector<128x512xf32>, vector<8x512xf32> -> vector<8x512xf32>
    %111 = arith.addf %108, %110 : vector<8x512xf32>
    %112 = vector.extract_strided_slice %111 {offsets = [0, 0], sizes = [8, 256], strides = [1, 1]} : vector<8x512xf32> to vector<8x256xf32>
    %cst_46 = arith.constant 5.000000e-01 : f32
    %113 = vector.broadcast %cst_46 : f32 to vector<8x256xf32>
    %114 = arith.mulf %113, %112 : vector<8x256xf32>
    %115 = math.tanh %114 : vector<8x256xf32>
    %cst_47 = arith.constant 5.000000e-01 : f32
    %116 = vector.broadcast %cst_47 : f32 to vector<8x256xf32>
    %117 = arith.mulf %116, %115 : vector<8x256xf32>
    %cst_48 = arith.constant 5.000000e-01 : f32
    %118 = vector.broadcast %cst_48 : f32 to vector<8x256xf32>
    %119 = arith.addf %117, %118 : vector<8x256xf32>
    %120 = vector.extract_strided_slice %111 {offsets = [0, 256], sizes = [8, 128], strides = [1, 1]} : vector<8x512xf32> to vector<8x128xf32>
    %121 = math.tanh %120 : vector<8x128xf32>
    %122 = vector.extract_strided_slice %111 {offsets = [0, 384], sizes = [8, 128], strides = [1, 1]} : vector<8x512xf32> to vector<8x128xf32>
    %cst_49 = arith.constant 5.000000e-01 : f32
    %123 = vector.broadcast %cst_49 : f32 to vector<8x128xf32>
    %124 = arith.mulf %123, %122 : vector<8x128xf32>
    %125 = math.tanh %124 : vector<8x128xf32>
    %cst_50 = arith.constant 5.000000e-01 : f32
    %126 = vector.broadcast %cst_50 : f32 to vector<8x128xf32>
    %127 = arith.mulf %126, %125 : vector<8x128xf32>
    %cst_51 = arith.constant 5.000000e-01 : f32
    %128 = vector.broadcast %cst_51 : f32 to vector<8x128xf32>
    %129 = arith.addf %127, %128 : vector<8x128xf32>
    %130 = vector.extract_strided_slice %119 {offsets = [0, 0], sizes = [8, 128], strides = [1, 1]} : vector<8x256xf32> to vector<8x128xf32>
    %131 = vector.extract_strided_slice %119 {offsets = [0, 128], sizes = [8, 128], strides = [1, 1]} : vector<8x256xf32> to vector<8x128xf32>
    %132 = arith.mulf %131, %102 : vector<8x128xf32>
    %133 = arith.mulf %130, %121 : vector<8x128xf32>
    %134 = arith.addf %132, %133 : vector<8x128xf32>
    %135 = math.tanh %134 : vector<8x128xf32>
    %136 = arith.mulf %129, %135 : vector<8x128xf32>
    %c4_i32 = arith.constant 4 : i32
    %c8_i32_52 = arith.constant 8 : i32
    %137 = arith.muli %c4_i32, %c8_i32_52 : i32
    %138 = tpu.assume_multiple %137, 8 : i32
    %139 = arith.index_cast %138 : i32 to index
    %c0_53 = arith.constant 0 : index
    %140 = vector.load %arg8[%139, %c0_53] : memref<64x512xf32, #tpu.memory_space<vmem>>, vector<8x512xf32>
    %c0_54 = arith.constant 0 : index
    %c0_55 = arith.constant 0 : index
    %141 = vector.load %arg3[%c0_54, %c0_55] : memref<128x512xf32, #tpu.memory_space<vmem>>, vector<128x512xf32>
    %cst_56 = arith.constant dense<0.000000e+00> : vector<8x512xf32>
    %142 = tpu.matmul %136, %141, %cst_56 {dimension_numbers = #tpu.dot_dimension_numbers<[1], [0], [0], [1], [0, 0, 1, 1], [], []>} : vector<8x128xf32>, vector<128x512xf32>, vector<8x512xf32> -> vector<8x512xf32>
    %143 = arith.addf %140, %142 : vector<8x512xf32>
    %144 = vector.extract_strided_slice %143 {offsets = [0, 0], sizes = [8, 256], strides = [1, 1]} : vector<8x512xf32> to vector<8x256xf32>
    %cst_57 = arith.constant 5.000000e-01 : f32
    %145 = vector.broadcast %cst_57 : f32 to vector<8x256xf32>
    %146 = arith.mulf %145, %144 : vector<8x256xf32>
    %147 = math.tanh %146 : vector<8x256xf32>
    %cst_58 = arith.constant 5.000000e-01 : f32
    %148 = vector.broadcast %cst_58 : f32 to vector<8x256xf32>
    %149 = arith.mulf %148, %147 : vector<8x256xf32>
    %cst_59 = arith.constant 5.000000e-01 : f32
    %150 = vector.broadcast %cst_59 : f32 to vector<8x256xf32>
    %151 = arith.addf %149, %150 : vector<8x256xf32>
    %152 = vector.extract_strided_slice %143 {offsets = [0, 256], sizes = [8, 128], strides = [1, 1]} : vector<8x512xf32> to vector<8x128xf32>
    %153 = math.tanh %152 : vector<8x128xf32>
    %154 = vector.extract_strided_slice %143 {offsets = [0, 384], sizes = [8, 128], strides = [1, 1]} : vector<8x512xf32> to vector<8x128xf32>
    %cst_60 = arith.constant 5.000000e-01 : f32
    %155 = vector.broadcast %cst_60 : f32 to vector<8x128xf32>
    %156 = arith.mulf %155, %154 : vector<8x128xf32>
    %157 = math.tanh %156 : vector<8x128xf32>
    %cst_61 = arith.constant 5.000000e-01 : f32
    %158 = vector.broadcast %cst_61 : f32 to vector<8x128xf32>
    %159 = arith.mulf %158, %157 : vector<8x128xf32>
    %cst_62 = arith.constant 5.000000e-01 : f32
    %160 = vector.broadcast %cst_62 : f32 to vector<8x128xf32>
    %161 = arith.addf %159, %160 : vector<8x128xf32>
    %162 = vector.extract_strided_slice %151 {offsets = [0, 0], sizes = [8, 128], strides = [1, 1]} : vector<8x256xf32> to vector<8x128xf32>
    %163 = vector.extract_strided_slice %151 {offsets = [0, 128], sizes = [8, 128], strides = [1, 1]} : vector<8x256xf32> to vector<8x128xf32>
    %164 = arith.mulf %163, %134 : vector<8x128xf32>
    %165 = arith.mulf %162, %153 : vector<8x128xf32>
    %166 = arith.addf %164, %165 : vector<8x128xf32>
    %167 = math.tanh %166 : vector<8x128xf32>
    %168 = arith.mulf %161, %167 : vector<8x128xf32>
    %c5_i32 = arith.constant 5 : i32
    %c8_i32_63 = arith.constant 8 : i32
    %169 = arith.muli %c5_i32, %c8_i32_63 : i32
    %170 = tpu.assume_multiple %169, 8 : i32
    %171 = arith.index_cast %170 : i32 to index
    %c0_64 = arith.constant 0 : index
    %172 = vector.load %arg8[%171, %c0_64] : memref<64x512xf32, #tpu.memory_space<vmem>>, vector<8x512xf32>
    %c0_65 = arith.constant 0 : index
    %c0_66 = arith.constant 0 : index
    %173 = vector.load %arg3[%c0_65, %c0_66] : memref<128x512xf32, #tpu.memory_space<vmem>>, vector<128x512xf32>
    %cst_67 = arith.constant dense<0.000000e+00> : vector<8x512xf32>
    %174 = tpu.matmul %168, %173, %cst_67 {dimension_numbers = #tpu.dot_dimension_numbers<[1], [0], [0], [1], [0, 0, 1, 1], [], []>} : vector<8x128xf32>, vector<128x512xf32>, vector<8x512xf32> -> vector<8x512xf32>
    %175 = arith.addf %172, %174 : vector<8x512xf32>
    %176 = vector.extract_strided_slice %175 {offsets = [0, 0], sizes = [8, 256], strides = [1, 1]} : vector<8x512xf32> to vector<8x256xf32>
    %cst_68 = arith.constant 5.000000e-01 : f32
    %177 = vector.broadcast %cst_68 : f32 to vector<8x256xf32>
    %178 = arith.mulf %177, %176 : vector<8x256xf32>
    %179 = math.tanh %178 : vector<8x256xf32>
    %cst_69 = arith.constant 5.000000e-01 : f32
    %180 = vector.broadcast %cst_69 : f32 to vector<8x256xf32>
    %181 = arith.mulf %180, %179 : vector<8x256xf32>
    %cst_70 = arith.constant 5.000000e-01 : f32
    %182 = vector.broadcast %cst_70 : f32 to vector<8x256xf32>
    %183 = arith.addf %181, %182 : vector<8x256xf32>
    %184 = vector.extract_strided_slice %175 {offsets = [0, 256], sizes = [8, 128], strides = [1, 1]} : vector<8x512xf32> to vector<8x128xf32>
    %185 = math.tanh %184 : vector<8x128xf32>
    %186 = vector.extract_strided_slice %175 {offsets = [0, 384], sizes = [8, 128], strides = [1, 1]} : vector<8x512xf32> to vector<8x128xf32>
    %cst_71 = arith.constant 5.000000e-01 : f32
    %187 = vector.broadcast %cst_71 : f32 to vector<8x128xf32>
    %188 = arith.mulf %187, %186 : vector<8x128xf32>
    %189 = math.tanh %188 : vector<8x128xf32>
    %cst_72 = arith.constant 5.000000e-01 : f32
    %190 = vector.broadcast %cst_72 : f32 to vector<8x128xf32>
    %191 = arith.mulf %190, %189 : vector<8x128xf32>
    %cst_73 = arith.constant 5.000000e-01 : f32
    %192 = vector.broadcast %cst_73 : f32 to vector<8x128xf32>
    %193 = arith.addf %191, %192 : vector<8x128xf32>
    %194 = vector.extract_strided_slice %183 {offsets = [0, 0], sizes = [8, 128], strides = [1, 1]} : vector<8x256xf32> to vector<8x128xf32>
    %195 = vector.extract_strided_slice %183 {offsets = [0, 128], sizes = [8, 128], strides = [1, 1]} : vector<8x256xf32> to vector<8x128xf32>
    %196 = arith.mulf %195, %166 : vector<8x128xf32>
    %197 = arith.mulf %194, %185 : vector<8x128xf32>
    %198 = arith.addf %196, %197 : vector<8x128xf32>
    %199 = math.tanh %198 : vector<8x128xf32>
    %200 = arith.mulf %193, %199 : vector<8x128xf32>
    %c6_i32 = arith.constant 6 : i32
    %c8_i32_74 = arith.constant 8 : i32
    %201 = arith.muli %c6_i32, %c8_i32_74 : i32
    %202 = tpu.assume_multiple %201, 8 : i32
    %203 = arith.index_cast %202 : i32 to index
    %c0_75 = arith.constant 0 : index
    %204 = vector.load %arg8[%203, %c0_75] : memref<64x512xf32, #tpu.memory_space<vmem>>, vector<8x512xf32>
    %c0_76 = arith.constant 0 : index
    %c0_77 = arith.constant 0 : index
    %205 = vector.load %arg3[%c0_76, %c0_77] : memref<128x512xf32, #tpu.memory_space<vmem>>, vector<128x512xf32>
    %cst_78 = arith.constant dense<0.000000e+00> : vector<8x512xf32>
    %206 = tpu.matmul %200, %205, %cst_78 {dimension_numbers = #tpu.dot_dimension_numbers<[1], [0], [0], [1], [0, 0, 1, 1], [], []>} : vector<8x128xf32>, vector<128x512xf32>, vector<8x512xf32> -> vector<8x512xf32>
    %207 = arith.addf %204, %206 : vector<8x512xf32>
    %208 = vector.extract_strided_slice %207 {offsets = [0, 0], sizes = [8, 256], strides = [1, 1]} : vector<8x512xf32> to vector<8x256xf32>
    %cst_79 = arith.constant 5.000000e-01 : f32
    %209 = vector.broadcast %cst_79 : f32 to vector<8x256xf32>
    %210 = arith.mulf %209, %208 : vector<8x256xf32>
    %211 = math.tanh %210 : vector<8x256xf32>
    %cst_80 = arith.constant 5.000000e-01 : f32
    %212 = vector.broadcast %cst_80 : f32 to vector<8x256xf32>
    %213 = arith.mulf %212, %211 : vector<8x256xf32>
    %cst_81 = arith.constant 5.000000e-01 : f32
    %214 = vector.broadcast %cst_81 : f32 to vector<8x256xf32>
    %215 = arith.addf %213, %214 : vector<8x256xf32>
    %216 = vector.extract_strided_slice %207 {offsets = [0, 256], sizes = [8, 128], strides = [1, 1]} : vector<8x512xf32> to vector<8x128xf32>
    %217 = math.tanh %216 : vector<8x128xf32>
    %218 = vector.extract_strided_slice %207 {offsets = [0, 384], sizes = [8, 128], strides = [1, 1]} : vector<8x512xf32> to vector<8x128xf32>
    %cst_82 = arith.constant 5.000000e-01 : f32
    %219 = vector.broadcast %cst_82 : f32 to vector<8x128xf32>
    %220 = arith.mulf %219, %218 : vector<8x128xf32>
    %221 = math.tanh %220 : vector<8x128xf32>
    %cst_83 = arith.constant 5.000000e-01 : f32
    %222 = vector.broadcast %cst_83 : f32 to vector<8x128xf32>
    %223 = arith.mulf %222, %221 : vector<8x128xf32>
    %cst_84 = arith.constant 5.000000e-01 : f32
    %224 = vector.broadcast %cst_84 : f32 to vector<8x128xf32>
    %225 = arith.addf %223, %224 : vector<8x128xf32>
    %226 = vector.extract_strided_slice %215 {offsets = [0, 0], sizes = [8, 128], strides = [1, 1]} : vector<8x256xf32> to vector<8x128xf32>
    %227 = vector.extract_strided_slice %215 {offsets = [0, 128], sizes = [8, 128], strides = [1, 1]} : vector<8x256xf32> to vector<8x128xf32>
    %228 = arith.mulf %227, %198 : vector<8x128xf32>
    %229 = arith.mulf %226, %217 : vector<8x128xf32>
    %230 = arith.addf %228, %229 : vector<8x128xf32>
    %231 = math.tanh %230 : vector<8x128xf32>
    %232 = arith.mulf %225, %231 : vector<8x128xf32>
    %c7_i32 = arith.constant 7 : i32
    %c8_i32_85 = arith.constant 8 : i32
    %233 = arith.muli %c7_i32, %c8_i32_85 : i32
    %234 = tpu.assume_multiple %233, 8 : i32
    %235 = arith.index_cast %234 : i32 to index
    %c0_86 = arith.constant 0 : index
    %236 = vector.load %arg8[%235, %c0_86] : memref<64x512xf32, #tpu.memory_space<vmem>>, vector<8x512xf32>
    %c0_87 = arith.constant 0 : index
    %c0_88 = arith.constant 0 : index
    %237 = vector.load %arg3[%c0_87, %c0_88] : memref<128x512xf32, #tpu.memory_space<vmem>>, vector<128x512xf32>
    %cst_89 = arith.constant dense<0.000000e+00> : vector<8x512xf32>
    %238 = tpu.matmul %232, %237, %cst_89 {dimension_numbers = #tpu.dot_dimension_numbers<[1], [0], [0], [1], [0, 0, 1, 1], [], []>} : vector<8x128xf32>, vector<128x512xf32>, vector<8x512xf32> -> vector<8x512xf32>
    %239 = arith.addf %236, %238 : vector<8x512xf32>
    %240 = vector.extract_strided_slice %239 {offsets = [0, 0], sizes = [8, 256], strides = [1, 1]} : vector<8x512xf32> to vector<8x256xf32>
    %cst_90 = arith.constant 5.000000e-01 : f32
    %241 = vector.broadcast %cst_90 : f32 to vector<8x256xf32>
    %242 = arith.mulf %241, %240 : vector<8x256xf32>
    %243 = math.tanh %242 : vector<8x256xf32>
    %cst_91 = arith.constant 5.000000e-01 : f32
    %244 = vector.broadcast %cst_91 : f32 to vector<8x256xf32>
    %245 = arith.mulf %244, %243 : vector<8x256xf32>
    %cst_92 = arith.constant 5.000000e-01 : f32
    %246 = vector.broadcast %cst_92 : f32 to vector<8x256xf32>
    %247 = arith.addf %245, %246 : vector<8x256xf32>
    %248 = vector.extract_strided_slice %239 {offsets = [0, 256], sizes = [8, 128], strides = [1, 1]} : vector<8x512xf32> to vector<8x128xf32>
    %249 = math.tanh %248 : vector<8x128xf32>
    %250 = vector.extract_strided_slice %239 {offsets = [0, 384], sizes = [8, 128], strides = [1, 1]} : vector<8x512xf32> to vector<8x128xf32>
    %cst_93 = arith.constant 5.000000e-01 : f32
    %251 = vector.broadcast %cst_93 : f32 to vector<8x128xf32>
    %252 = arith.mulf %251, %250 : vector<8x128xf32>
    %253 = math.tanh %252 : vector<8x128xf32>
    %cst_94 = arith.constant 5.000000e-01 : f32
    %254 = vector.broadcast %cst_94 : f32 to vector<8x128xf32>
    %255 = arith.mulf %254, %253 : vector<8x128xf32>
    %cst_95 = arith.constant 5.000000e-01 : f32
    %256 = vector.broadcast %cst_95 : f32 to vector<8x128xf32>
    %257 = arith.addf %255, %256 : vector<8x128xf32>
    %258 = vector.extract_strided_slice %247 {offsets = [0, 0], sizes = [8, 128], strides = [1, 1]} : vector<8x256xf32> to vector<8x128xf32>
    %259 = vector.extract_strided_slice %247 {offsets = [0, 128], sizes = [8, 128], strides = [1, 1]} : vector<8x256xf32> to vector<8x128xf32>
    %260 = arith.mulf %259, %230 : vector<8x128xf32>
    %261 = arith.mulf %258, %249 : vector<8x128xf32>
    %262 = arith.addf %260, %261 : vector<8x128xf32>
    %263 = math.tanh %262 : vector<8x128xf32>
    %264 = arith.mulf %257, %263 : vector<8x128xf32>
    %c8_i32_96 = arith.constant 8 : i32
    %c0_97 = arith.constant 0 : index
    %c0_98 = arith.constant 0 : index
    %265 = vector.load %arg5[%c0_97, %c0_98] : memref<128x128xf32, #tpu.memory_space<vmem>>, vector<128x128xf32>
    %cst_99 = arith.constant dense<0.000000e+00> : vector<8x128xf32>
    %266 = tpu.matmul %264, %265, %cst_99 {dimension_numbers = #tpu.dot_dimension_numbers<[1], [0], [0], [1], [0, 0, 1, 1], [], []>} : vector<8x128xf32>, vector<128x128xf32>, vector<8x128xf32> -> vector<8x128xf32>
    %c0_100 = arith.constant 0 : index
    %c0_101 = arith.constant 0 : index
    %267 = vector.load %arg6[%c0_100, %c0_101] : memref<1x128xf32, #tpu.memory_space<vmem>>, vector<1x128xf32>
    %268 = vector.broadcast %267 : vector<1x128xf32> to vector<8x128xf32>
    %269 = arith.addf %266, %268 : vector<8x128xf32>
    %c0_102 = arith.constant 0 : index
    %c0_103 = arith.constant 0 : index
    %270 = vector.load %arg7[%c0_102, %c0_103] : memref<8x128xf32, #tpu.memory_space<vmem>>, vector<8x128xf32>
    tpu.vector_store %arg7[%c0_102, %c0_103], %269 {strides = array<i32>} : memref<8x128xf32, #tpu.memory_space<vmem>>, vector<8x128xf32>,
    return
  }
  func.func @transform_0(%arg0: i32) -> (i32, i32) {
    %c0_i32 = arith.constant 0 : i32
    %c0_i32_0 = arith.constant 0 : i32
    %c0_i32_1 = arith.constant 0 : i32
    return %c0_i32, %c0_i32_0 : i32, i32
  }
  func.func @transform_1(%arg0: i32) -> (i32, i32) {
    %c0_i32 = arith.constant 0 : i32
    %c0_i32_0 = arith.constant 0 : i32
    %c0_i32_1 = arith.constant 0 : i32
    return %c0_i32, %c0_i32_0 : i32, i32
  }
  func.func @transform_2(%arg0: i32) -> (i32, i32) {
    %c0_i32 = arith.constant 0 : i32
    %c0_i32_0 = arith.constant 0 : i32
    %c0_i32_1 = arith.constant 0 : i32
    return %c0_i32, %c0_i32_0 : i32, i32
  }
  func.func @transform_3(%arg0: i32) -> (i32, i32) {
    %c0_i32 = arith.constant 0 : i32
    %c0_i32_0 = arith.constant 0 : i32
    %c0_i32_1 = arith.constant 0 : i32
    return %c0_i32, %c0_i32_0 : i32, i32
  }
  func.func @transform_4(%arg0: i32) -> (i32, i32) {
    %c0_i32 = arith.constant 0 : i32
    %c0_i32_0 = arith.constant 0 : i32
    %c0_i32_1 = arith.constant 0 : i32
    return %c0_i32, %c0_i32_0 : i32, i32
  }
  func.func @transform_5(%arg0: i32) -> (i32, i32) {
    %c0_i32 = arith.constant 0 : i32
    %c0_i32_0 = arith.constant 0 : i32
    %c0_i32_1 = arith.constant 0 : i32
    return %c0_i32, %c0_i32_0 : i32, i32
  }
  func.func @transform_6(%arg0: i32) -> (i32, i32) {
    %c0_i32 = arith.constant 0 : i32
    %c0_i32_0 = arith.constant 0 : i32
    %c0_i32_1 = arith.constant 0 : i32
    return %c0_i32, %c0_i32_0 : i32, i32
  }
}

</mosaic_0001>

<bundles_post_ra>
// kernel: tpu_custom_call.1
= control target key start
LH: loop header
LB: loop body
LE: loop exit
PB: predicated region body
PF: predicated region fallthrough
CT: control target
= control target key end

     0   :  { %11 = vsyncpa [#allocation4], 0  ;;  %s3333_s0 = inlined_call_operand.hbm [shape: f32[64,128], index: 0, kind: input, shape index: {}]   ;;  %s3334_s1 = inlined_call_operand.hbm [shape: f32[128,512], index: 1, kind: input, shape index: {}]   ;;  %s3335_s2 = inlined_call_operand.hbm [shape: f32[128,512], index: 2, kind: input, shape index: {}]   ;;  %s3336_s3 = inlined_call_operand.vmem [shape: f32[1,512], index: 3, kind: input, shape index: {}]   ;;  %s3337_s4 = inlined_call_operand.hbm [shape: f32[128,128], index: 4, kind: input, shape index: {}]   ;;  %s3338_s5 = inlined_call_operand.vmem [shape: f32[1,128], index: 5, kind: input, shape index: {}]   ;;  %s3339_s6 = inlined_call_operand.hbm [shape: f32[8,128], index: 6, kind: output, shape index: {}]  }
   0x1   :  { %12 = vsyncpa [#allocation7], 0 }
   0x2   :  { %13 = vsyncpa [#allocation10], 0 }
   0x3   :  { %14 = vsyncpa [#allocation5], 0  ;;  %s2297_s21 = smov [#allocation6]  }
   0x4   :  { %s32_s22 = sshll.u32 %s2297_s21, 4  ;;  %s33_s22 = int_to_ptr.vmem [resolvable:$true] %s32_s22 }
   0x5   :  { %s2197_s23 = scalar_lea.vmem %s33_s22, 8192  ;;  %p2202_p1 = scmp.lt.s32.totalorder %s33_s22, %s33_s22 }
   0x6   :  { %p2198_p0 = scmp.ne.s32.totalorder %s33_s22, %s2197_s23  ;;  %p2203_p2 = scmp.lt.s32.totalorder %s2197_s23, %s2197_s23 }
   0x8   :  { %p2204_p3 = por %p2203_p2, %p2202_p1 }
   0xa   :  { %p2205_p4 = pnand %p2204_p3, %p2198_p0 }
   0xc   :  { %2208 = shalt.err (!%p2205_p4)
}
   0xd   :  { %s2298_s24 = smov 512   ;;  %s2299_s25 = smov 32  }
   0xe   :  { %38 = dma.hbm_to_vmem [thread:$0]  %s3334_s1, 8192, %s33_s22, [#allocation7], %s2298_s24, %s2298_s24, %s2299_s25  }
   0xf   :  { %s2300_s28 = smov [#allocation3]  }
  0x10   :  { %s20_s29 = sshll.u32 %s2300_s28, 4  ;;  %s21_s29 = int_to_ptr.vmem [resolvable:$true] %s20_s29 }
  0x11   :  { %s2217_s30 = scalar_lea.vmem %s21_s29, 1024  ;;  %p2222_p6 = scmp.lt.s32.totalorder %s21_s29, %s21_s29 }
  0x12   :  { %p2218_p5 = scmp.ne.s32.totalorder %s21_s29, %s2217_s30  ;;  %p2223_p7 = scmp.lt.s32.totalorder %s2217_s30, %s2217_s30 }
  0x14   :  { %p2224_p8 = por %p2223_p7, %p2222_p6 }
  0x16   :  { %p2225_p9 = pnand %p2224_p8, %p2218_p5 }
  0x18   :  { %2228 = shalt.err (!%p2225_p9)
}
  0x19   :  { %s2301_s7 = smov 128   ;;  %s2302_s8 = smov 8  }
  0x1a   :  { %26 = dma.hbm_to_vmem [thread:$0]  %s3333_s0, 1024, %s21_s29, [#allocation4], %s2301_s7, %s2301_s7, %s2302_s8  }
  0x1b   :  { %s2303_s11 = smov [#allocation8]   ;;  %s2304_s13 = smov [#allocation9]  }
  0x1c   :  { %s44_s12 = sshll.u32 %s2303_s11, 4  ;;  %s58_s1 = sshll.u32 %s2304_s13, 4  ;;  %s45_s12 = int_to_ptr.vmem [resolvable:$true] %s44_s12  ;;  %s59_s1 = int_to_ptr.vmem [resolvable:$true] %s58_s1 }
  0x1d   :  { %s2237_s14 = scalar_lea.vmem %s45_s12, 8192  ;;  %p2242_p11 = scmp.lt.s32.totalorder %s45_s12, %s45_s12 }
  0x1e   :  { %p2238_p10 = scmp.ne.s32.totalorder %s45_s12, %s2237_s14  ;;  %p2243_p12 = scmp.lt.s32.totalorder %s2237_s14, %s2237_s14 }
  0x20   :  { %p2244_p13 = por %p2243_p12, %p2242_p11 }
  0x22   :  { %p2245_p0 = pnand %p2244_p13, %p2238_p10 }
  0x24   :  { %2248 = shalt.err (!%p2245_p0)
}
  0x25   :  { %50 = dma.hbm_to_vmem [thread:$0]  %s3335_s2, 8192, %s45_s12, [#allocation7], %s2298_s24, %s2298_s24, %s2299_s25  }
  0x26   :  { %s2257_s0 = scalar_lea.vmem %s59_s1, 2048  ;;  %p2262_p2 = scmp.lt.s32.totalorder %s59_s1, %s59_s1 }
  0x27   :  { %p2258_p1 = scmp.ne.s32.totalorder %s59_s1, %s2257_s0  ;;  %p2263_p3 = scmp.lt.s32.totalorder %s2257_s0, %s2257_s0 }
  0x29   :  { %p2264_p4 = por %p2263_p3, %p2262_p2 }
  0x2b   :  { %p2265_p5 = pnand %p2264_p4, %p2258_p1 }
  0x2d   :  { %2268 = shalt.err (!%p2265_p5)
}
  0x2e   :  { %64 = dma.hbm_to_vmem [thread:$0]  %s3337_s4, 2048, %s59_s1, [#allocation10], %s2301_s7, %s2301_s7, %s2302_s8  }
  0x2f   :  { %2289 = dma.done.wait [#allocation4], 1024  }
  0x30   :  { %2290 = vsyncadd [#allocation4], 4294966272 }
  0x31   :  { %2291 = dma.done.wait [#allocation7], 16384  }
  0x32   :  { %2292 = vsyncadd [#allocation7], 4294950912 }
  0x33   :  { %2293 = dma.done.wait [#allocation10], 2048  }
  0x34   :  { %2294 = vsyncadd [#allocation10], 4294965248  ;;  %v3340_v0 = vmov 0.0   ;;  %v148_v1 = vld [vmem:[#allocation6 + $0x1e8] sm:$0xff]  ;;  %v150_v2 = vld [vmem:[#allocation6 + $0x1f8] sm:$0xff]  ;;  %vm2306_vm0 = vmmov 0  }
  0x35   :  { %237 = vmatprep.mubr.f32.mxu0 %v3340_v0  ;;  %350 = vmatprep.mubr.f32.mxu1 %v3340_v0  ;;  %v147_v3 = vld [vmem:[#allocation6 + $0x1e0] sm:$0xff]  ;;  %v149_v4 = vld [vmem:[#allocation6 + $0x1f0] sm:$0xff]  ;;  %v144_v5 = vld [vmem:[#allocation6 + $0x1c8] sm:$0xff]  ;;  %s2307_s20 = smov [#allocation11]  }
  0x36   :  { %173 = vmatprep.subr.mxu0 %v148_v1  ;;  %286 = vmatprep.subr.mxu1 %v150_v2  ;;  %v146_v6 = vld [vmem:[#allocation6 + $0x1d8] sm:$0xff]  ;;  %v143_v7 = vld [vmem:[#allocation6 + $0x1c0] sm:$0xff]  ;;  %v145_v8 = vld [vmem:[#allocation6 + $0x1d0] sm:$0xff]  ;;  %s1963_s21 = sshll.u32 %s2307_s20, 4  ;;  %s1964_s21 = int_to_ptr.vmem [resolvable:$true] %s1963_s21 }
  0x37   :  { %174 = vmatpush1.msra.mxu0 %v147_v3  ;;  %287 = vmatpush1.msra.mxu1 %v149_v4  ;;  %v140_v9 = vld [vmem:[#allocation6 + $0x1a8] sm:$0xff]  ;;  %v142_v10 = vld [vmem:[#allocation6 + $0x1b8] sm:$0xff]  ;;  %v139_v11 = vld [vmem:[#allocation6 + $0x1a0] sm:$0xff]  ;;  %s2269_s22 = scalar_lea.vmem %s1964_s21, 128  ;;  %p2274_p7 = scmp.lt.s32.totalorder %s1964_s21, %s1964_s21 }
  0x38   :  { %175 = vmatprep.subr.mxu0 %v144_v5  ;;  %288 = vmatprep.subr.mxu1 %v146_v6  ;;  %v141_v12 = vld [vmem:[#allocation6 + $0x1b0] sm:$0xff]  ;;  %v136_v13 = vld [vmem:[#allocation6 + $0x188] sm:$0xff]  ;;  %v138_v14 = vld [vmem:[#allocation6 + $0x198] sm:$0xff]  ;;  %p2270_p6 = scmp.ne.s32.totalorder %s1964_s21, %s2269_s22  ;;  %p2275_p8 = scmp.lt.s32.totalorder %s2269_s22, %s2269_s22 }
  0x39   :  { %176 = vmatpush1.msra.mxu0 %v143_v7  ;;  %289 = vmatpush1.msra.mxu1 %v145_v8  ;;  %v135_v15 = vld [vmem:[#allocation6 + $0x180] sm:$0xff]  ;;  %v137_v16 = vld [vmem:[#allocation6 + $0x190] sm:$0xff]  ;;  %v132_v17 = vld [vmem:[#allocation6 + $0x168] sm:$0xff] }
  0x3a   :  { %177 = vmatprep.subr.mxu0 %v140_v9  ;;  %290 = vmatprep.subr.mxu1 %v142_v10  ;;  %v134_v18 = vld [vmem:[#allocation6 + $0x178] sm:$0xff]  ;;  %v131_v19 = vld [vmem:[#allocation6 + $0x160] sm:$0xff]  ;;  %v133_v20 = vld [vmem:[#allocation6 + $0x170] sm:$0xff]  ;;  %p2276_p9 = por %p2275_p8, %p2274_p7 }
  0x3b   :  { %178 = vmatpush1.msra.mxu0 %v139_v11  ;;  %291 = vmatpush1.msra.mxu1 %v141_v12  ;;  %v128_v21 = vld [vmem:[#allocation6 + $0x148] sm:$0xff]  ;;  %v130_v22 = vld [vmem:[#allocation6 + $0x158] sm:$0xff]  ;;  %v127_v23 = vld [vmem:[#allocation6 + $0x140] sm:$0xff] }
  0x3c   :  { %179 = vmatprep.subr.mxu0 %v136_v13  ;;  %292 = vmatprep.subr.mxu1 %v138_v14  ;;  %v129_v24 = vld [vmem:[#allocation6 + $0x150] sm:$0xff]  ;;  %v124_v25 = vld [vmem:[#allocation6 + $0x128] sm:$0xff]  ;;  %v126_v26 = vld [vmem:[#allocation6 + $0x138] sm:$0xff]  ;;  %p2277_p10 = pnand %p2276_p9, %p2270_p6 }
  0x3d   :  { %180 = vmatpush1.msra.mxu0 %v135_v15  ;;  %293 = vmatpush1.msra.mxu1 %v137_v16  ;;  %v123_v27 = vld [vmem:[#allocation6 + $0x120] sm:$0xff]  ;;  %v125_v28 = vld [vmem:[#allocation6 + $0x130] sm:$0xff]  ;;  %v120_v29 = vld [vmem:[#allocation6 + $0x108] sm:$0xff] }
  0x3e   :  { %181 = vmatprep.subr.mxu0 %v132_v17  ;;  %294 = vmatprep.subr.mxu1 %v134_v18  ;;  %v122_v30 = vld [vmem:[#allocation6 + $0x118] sm:$0xff]  ;;  %v119_v31 = vld [vmem:[#allocation6 + $0x100] sm:$0xff]  ;;  %v121_v32 = vld [vmem:[#allocation6 + $0x110] sm:$0xff] }
  0x3f   :  { %182 = vmatpush1.msra.mxu0 %v131_v19  ;;  %295 = vmatpush1.msra.mxu1 %v133_v20  ;;  %v116_v33 = vld [vmem:[#allocation6 + $0xe8] sm:$0xff]  ;;  %v118_v34 = vld [vmem:[#allocation6 + $0xf8] sm:$0xff]  ;;  %v115_v35 = vld [vmem:[#allocation6 + $0xe0] sm:$0xff] }
  0x40   :  { %183 = vmatprep.subr.mxu0 %v128_v21  ;;  %296 = vmatprep.subr.mxu1 %v130_v22  ;;  %v117_v36 = vld [vmem:[#allocation6 + $0xf0] sm:$0xff]  ;;  %v112_v37 = vld [vmem:[#allocation6 + $0xc8] sm:$0xff]  ;;  %v114_v38 = vld [vmem:[#allocation6 + $0xd8] sm:$0xff] }
  0x41   :  { %184 = vmatpush1.msra.mxu0 %v127_v23  ;;  %297 = vmatpush1.msra.mxu1 %v129_v24  ;;  %v111_v39 = vld [vmem:[#allocation6 + $0xc0] sm:$0xff]  ;;  %v113_v40 = vld [vmem:[#allocation6 + $0xd0] sm:$0xff]  ;;  %v108_v41 = vld [vmem:[#allocation6 + $0xa8] sm:$0xff] }
  0x42   :  { %185 = vmatprep.subr.mxu0 %v124_v25  ;;  %298 = vmatprep.subr.mxu1 %v126_v26  ;;  %v110_v42 = vld [vmem:[#allocation6 + $0xb8] sm:$0xff]  ;;  %v107_v43 = vld [vmem:[#allocation6 + $0xa0] sm:$0xff]  ;;  %v109_v44 = vld [vmem:[#allocation6 + $0xb0] sm:$0xff] }
  0x43   :  { %186 = vmatpush1.msra.mxu0 %v123_v27  ;;  %299 = vmatpush1.msra.mxu1 %v125_v28  ;;  %v104_v45 = vld [vmem:[#allocation6 + $0x88] sm:$0xff]  ;;  %v106_v46 = vld [vmem:[#allocation6 + $0x98] sm:$0xff]  ;;  %v103_v47 = vld [vmem:[#allocation6 + $0x80] sm:$0xff] }
  0x44   :  { %187 = vmatprep.subr.mxu0 %v120_v29  ;;  %300 = vmatprep.subr.mxu1 %v122_v30  ;;  %v105_v48 = vld [vmem:[#allocation6 + $0x90] sm:$0xff]  ;;  %v100_v49 = vld [vmem:[#allocation6 + $0x68] sm:$0xff]  ;;  %v102_v50 = vld [vmem:[#allocation6 + $0x78] sm:$0xff] }
  0x45   :  { %188 = vmatpush1.msra.mxu0 %v119_v31  ;;  %301 = vmatpush1.msra.mxu1 %v121_v32  ;;  %v99_v51 = vld [vmem:[#allocation6 + $0x60] sm:$0xff]  ;;  %v101_v52 = vld [vmem:[#allocation6 + $0x70] sm:$0xff]  ;;  %v96_v53 = vld [vmem:[#allocation6 + $0x48] sm:$0xff] }
  0x46   :  { %189 = vmatprep.subr.mxu0 %v116_v33  ;;  %302 = vmatprep.subr.mxu1 %v118_v34  ;;  %v98_v54 = vld [vmem:[#allocation6 + $0x58] sm:$0xff]  ;;  %v95_v55 = vld [vmem:[#allocation6 + $0x40] sm:$0xff]  ;;  %v97_v56 = vld [vmem:[#allocation6 + $0x50] sm:$0xff] }
  0x47   :  { %190 = vmatpush1.msra.mxu0 %v115_v35  ;;  %303 = vmatpush1.msra.mxu1 %v117_v36  ;;  %v92_v57 = vld [vmem:[#allocation6 + $0x28] sm:$0xff]  ;;  %v94_v58 = vld [vmem:[#allocation6 + $0x38] sm:$0xff]  ;;  %v91_v59 = vld [vmem:[#allocation6 + $0x20] sm:$0xff] }
  0x48   :  { %191 = vmatprep.subr.mxu0 %v112_v37  ;;  %304 = vmatprep.subr.mxu1 %v114_v38  ;;  %v93_v60 = vld [vmem:[#allocation6 + $0x30] sm:$0xff]  ;;  %v88_v61 = vld [vmem:[#allocation6 + $0x8] sm:$0xff]  ;;  %v90_v62 = vld [vmem:[#allocation6 + $0x18] sm:$0xff] }
  0x49   :  { %192 = vmatpush1.msra.mxu0 %v111_v39  ;;  %305 = vmatpush1.msra.mxu1 %v113_v40  ;;  %v87_v63 = vld [vmem:[#allocation6] sm:$0xff]  ;;  %v89_v1 = vld [vmem:[#allocation6 + $0x10] sm:$0xff]  ;;  %v2363_v3 = vld [vmem:[#allocation8 + $0x1e8] sm:$0xff] }
  0x4a   :  { %193 = vmatprep.subr.mxu0 %v108_v41  ;;  %306 = vmatprep.subr.mxu1 %v110_v42  ;;  %v79_v2 = vld [vmem:[#allocation3] sm:$0xff]  ;;  %3430 = vst [vmem:[#allocation16_spill] sm:$0xff] %v2363_v3  ;;  %v2365_v4 = vld [vmem:[#allocation8 + $0x1f8] sm:$0xff]  ;;  %v2369_v6 = vld [vmem:[#allocation8 + $0x1f0] sm:$0xff] }
  0x4b   :  { %194 = vmatpush1.msra.mxu0 %v107_v43  ;;  %307 = vmatpush1.msra.mxu1 %v109_v44  ;;  %3431 = vst [vmem:[#allocation17_spill] sm:$0xff] %v2365_v4  ;;  %v2367_v5 = vld [vmem:[#allocation8 + $0x1e0] sm:$0xff]  ;;  %v2371_v7 = vld [vmem:[#allocation8 + $0x1c8] sm:$0xff]  ;;  %v2373_v8 = vld [vmem:[#allocation8 + $0x1d8] sm:$0xff] }
  0x4c   :  { %195 = vmatprep.subr.mxu0 %v104_v45  ;;  %308 = vmatprep.subr.mxu1 %v106_v46  ;;  %v2379_v9 = vld [vmem:[#allocation8 + $0x1c0] sm:$0xff]  ;;  %v2381_v10 = vld [vmem:[#allocation8 + $0x1d0] sm:$0xff]  ;;  %v80_v11 = vld [vmem:[#allocation3 + $0x8] sm:$0xff] }
  0x4d   :  { %196 = vmatpush1.msra.mxu0 %v103_v47  ;;  %309 = vmatpush1.msra.mxu1 %v105_v48  ;;  %v2387_v12 = vld [vmem:[#allocation8 + $0x1a8] sm:$0xff]  ;;  %v2389_v13 = vld [vmem:[#allocation8 + $0x1b8] sm:$0xff]  ;;  %v2393_v14 = vld [vmem:[#allocation8 + $0x1a0] sm:$0xff] }
  0x4e   :  { %197 = vmatprep.subr.mxu0 %v100_v49  ;;  %310 = vmatprep.subr.mxu1 %v102_v50  ;;  %v2395_v15 = vld [vmem:[#allocation8 + $0x1b0] sm:$0xff]  ;;  %v2397_v16 = vld [vmem:[#allocation8 + $0x188] sm:$0xff]  ;;  %v2399_v17 = vld [vmem:[#allocation8 + $0x198] sm:$0xff] }
  0x4f   :  { %198 = vmatpush1.msra.mxu0 %v99_v51  ;;  %311 = vmatpush1.msra.mxu1 %v101_v52  ;;  %v2405_v18 = vld [vmem:[#allocation8 + $0x180] sm:$0xff]  ;;  %v2407_v19 = vld [vmem:[#allocation8 + $0x190] sm:$0xff]  ;;  %v2413_v21 = vld [vmem:[#allocation8 + $0x168] sm:$0xff] }
  0x50   :  { %199 = vmatprep.subr.mxu0 %v96_v53  ;;  %312 = vmatprep.subr.mxu1 %v98_v54  ;;  %v81_v20 = vld [vmem:[#allocation3 + $0x10] sm:$0xff]  ;;  %v2415_v22 = vld [vmem:[#allocation8 + $0x178] sm:$0xff]  ;;  %v2419_v23 = vld [vmem:[#allocation8 + $0x160] sm:$0xff] }
  0x51   :  { %200 = vmatpush1.msra.mxu0 %v95_v55  ;;  %313 = vmatpush1.msra.mxu1 %v97_v56  ;;  %v2421_v24 = vld [vmem:[#allocation8 + $0x170] sm:$0xff]  ;;  %v2423_v25 = vld [vmem:[#allocation8 + $0x148] sm:$0xff]  ;;  %v2425_v26 = vld [vmem:[#allocation8 + $0x158] sm:$0xff] }
  0x52   :  { %201 = vmatprep.subr.mxu0 %v92_v57  ;;  %314 = vmatprep.subr.mxu1 %v94_v58  ;;  %v2431_v27 = vld [vmem:[#allocation8 + $0x140] sm:$0xff]  ;;  %v2433_v28 = vld [vmem:[#allocation8 + $0x150] sm:$0xff]  ;;  %v82_v29 = vld [vmem:[#allocation3 + $0x18] sm:$0xff] }
  0x53   :  { %202 = vmatpush1.msra.mxu0 %v91_v59  ;;  %315 = vmatpush1.msra.mxu1 %v93_v60  ;;  %v2439_v30 = vld [vmem:[#allocation8 + $0x128] sm:$0xff]  ;;  %v2441_v31 = vld [vmem:[#allocation8 + $0x138] sm:$0xff]  ;;  %v2445_v32 = vld [vmem:[#allocation8 + $0x120] sm:$0xff] }
  0x54   :  { %203 = vmatprep.subr.mxu0 %v88_v61  ;;  %316 = vmatprep.subr.mxu1 %v90_v62  ;;  %v2447_v33 = vld [vmem:[#allocation8 + $0x130] sm:$0xff]  ;;  %v2449_v34 = vld [vmem:[#allocation8 + $0x108] sm:$0xff]  ;;  %v2451_v35 = vld [vmem:[#allocation8 + $0x118] sm:$0xff] }
  0x55   :  { %204 = vmatpush1.msra.mxu0 %v87_v63  ;;  %317 = vmatpush1.msra.mxu1 %v89_v1  ;;  %v2457_v36 = vld [vmem:[#allocation8 + $0x100] sm:$0xff]  ;;  %v2459_v37 = vld [vmem:[#allocation8 + $0x110] sm:$0xff]  ;;  %v2465_v39 = vld [vmem:[#allocation8 + $0xe8] sm:$0xff] }
  0x56   :  { %238 = vmatmul.mubr.f32.vlgmr.msra.gmra.mxu0 %v79_v2  ;;  %351 = vmatmul.mubr.f32.vlgmr.msra.gmra.mxu1 %v79_v2  ;;  %v83_v38 = vld [vmem:[#allocation3 + $0x20] sm:$0xff]  ;;  %v2467_v40 = vld [vmem:[#allocation8 + $0xf8] sm:$0xff]  ;;  %v2473_v42 = vld [vmem:[#allocation8 + $0xf0] sm:$0xff] }
  0x57   :  { %502 = vmatprep.subr.mxu0 %v2363_v3  ;;  %573 = vmatprep.subr.mxu1 %v2365_v4  ;;  %v2471_v41 = vld [vmem:[#allocation8 + $0xe0] sm:$0xff]  ;;  %v2475_v43 = vld [vmem:[#allocation8 + $0xc8] sm:$0xff]  ;;  %v2477_v44 = vld [vmem:[#allocation8 + $0xd8] sm:$0xff] }
  0x58   :  { %503 = vmatpush1.msra.mxu0 %v2367_v5  ;;  %574 = vmatpush1.msra.mxu1 %v2369_v6  ;;  %v2483_v45 = vld [vmem:[#allocation8 + $0xc0] sm:$0xff]  ;;  %v2485_v46 = vld [vmem:[#allocation8 + $0xd0] sm:$0xff]  ;;  %v84_v47 = vld [vmem:[#allocation3 + $0x28] sm:$0xff] }
  0x59   :  { %504 = vmatprep.subr.mxu0 %v2371_v7  ;;  %575 = vmatprep.subr.mxu1 %v2373_v8  ;;  %v2491_v48 = vld [vmem:[#allocation8 + $0xa8] sm:$0xff]  ;;  %v2493_v49 = vld [vmem:[#allocation8 + $0xb8] sm:$0xff]  ;;  %v2497_v50 = vld [vmem:[#allocation8 + $0xa0] sm:$0xff] }
  0x5a   :  { %243 = vmatprep.mubr.f32.mxu0 %v3340_v0  ;;  %356 = vmatprep.mubr.f32.mxu1 %v3340_v0  ;;  %v2499_v51 = vld [vmem:[#allocation8 + $0xb0] sm:$0xff]  ;;  %v2501_v52 = vld [vmem:[#allocation8 + $0x88] sm:$0xff]  ;;  %v2503_v53 = vld [vmem:[#allocation8 + $0x98] sm:$0xff] }
  0x5b   :  { %505 = vmatpush1.msra.mxu0 %v2379_v9  ;;  %576 = vmatpush1.msra.mxu1 %v2381_v10  ;;  %3432 = vst [vmem:[#allocation18_spill] sm:$0xff] %v2501_v52  ;;  %3433 = vst [vmem:[#allocation19_spill] sm:$0xff] %v2503_v53  ;;  %v2509_v54 = vld [vmem:[#allocation8 + $0x80] sm:$0xff]  ;;  %v2511_v55 = vld [vmem:[#allocation8 + $0x90] sm:$0xff] }
  0x5c   :  { %244 = vmatmul.mubr.f32.gmra.mxu0 %v80_v11  ;;  %357 = vmatmul.mubr.f32.gmra.mxu1 %v80_v11  ;;  %3434 = vst [vmem:[#allocation20_spill] sm:$0xff] %v2509_v54  ;;  %3435 = vst [vmem:[#allocation21_spill] sm:$0xff] %v2511_v55  ;;  %v85_v56 = vld [vmem:[#allocation3 + $0x30] sm:$0xff]  ;;  %v2517_v57 = vld [vmem:[#allocation8 + $0x68] sm:$0xff] }
  0x5d   :  { %506 = vmatprep.subr.mxu0 %v2387_v12  ;;  %577 = vmatprep.subr.mxu1 %v2389_v13  ;;  %3436 = vst [vmem:[#allocation22_spill] sm:$0xff] %v2517_v57  ;;  %v2519_v58 = vld [vmem:[#allocation8 + $0x78] sm:$0xff]  ;;  %v2523_v59 = vld [vmem:[#allocation8 + $0x60] sm:$0xff]  ;;  %v2525_v60 = vld [vmem:[#allocation8 + $0x70] sm:$0xff] }
  0x5e   :  { %507 = vmatpush1.msra.mxu0 %v2393_v14  ;;  %578 = vmatpush1.msra.mxu1 %v2395_v15  ;;  %3437 = vst [vmem:[#allocation23_spill] sm:$0xff] %v2519_v58  ;;  %3438 = vst [vmem:[#allocation24_spill] sm:$0xff] %v2523_v59  ;;  %v2527_v61 = vld [vmem:[#allocation8 + $0x48] sm:$0xff]  ;;  %v2529_v62 = vld [vmem:[#allocation8 + $0x58] sm:$0xff] }
  0x5f   :  { %508 = vmatprep.subr.mxu0 %v2397_v16  ;;  %579 = vmatprep.subr.mxu1 %v2399_v17  ;;  %3439 = vst [vmem:[#allocation25_spill] sm:$0xff] %v2525_v60  ;;  %3440 = vst [vmem:[#allocation26_spill] sm:$0xff] %v2527_v61  ;;  %v2535_v63 = vld [vmem:[#allocation8 + $0x40] sm:$0xff]  ;;  %v2537_v1 = vld [vmem:[#allocation8 + $0x50] sm:$0xff] }
  0x60   :  { %249 = vmatprep.mubr.f32.mxu0 %v3340_v0  ;;  %362 = vmatprep.mubr.f32.mxu1 %v3340_v0  ;;  %3441 = vst [vmem:[#allocation27_spill] sm:$0xff] %v2529_v62  ;;  %3442 = vst [vmem:[#allocation28_spill] sm:$0xff] %v2535_v63  ;;  %v86_v2 = vld [vmem:[#allocation3 + $0x38] sm:$0xff]  ;;  %v2543_v11 = vld [vmem:[#allocation8 + $0x28] sm:$0xff] }
  0x61   :  { %509 = vmatpush1.msra.mxu0 %v2405_v18  ;;  %580 = vmatpush1.msra.mxu1 %v2407_v19  ;;  %3443 = vst [vmem:[#allocation29_spill] sm:$0xff] %v2537_v1  ;;  %3444 = vst [vmem:[#allocation30_spill] sm:$0xff] %v2543_v11 }
  0x62   :  { %250 = vmatmul.mubr.f32.gmra.mxu0 %v81_v20  ;;  %363 = vmatmul.mubr.f32.gmra.mxu1 %v81_v20  ;;  %v2545_v20 = vld [vmem:[#allocation8 + $0x38] sm:$0xff] }
  0x63   :  { %510 = vmatprep.subr.mxu0 %v2413_v21  ;;  %581 = vmatprep.subr.mxu1 %v2415_v22  ;;  %3445 = vst [vmem:[#allocation31_spill] sm:$0xff] %v2545_v20 }
  0x64   :  { %511 = vmatpush1.msra.mxu0 %v2419_v23  ;;  %582 = vmatpush1.msra.mxu1 %v2421_v24 }
  0x65   :  { %512 = vmatprep.subr.mxu0 %v2423_v25  ;;  %583 = vmatprep.subr.mxu1 %v2425_v26 }
  0x66   :  { %255 = vmatprep.mubr.f32.mxu0 %v3340_v0  ;;  %368 = vmatprep.mubr.f32.mxu1 %v3340_v0 }
  0x67   :  { %513 = vmatpush1.msra.mxu0 %v2431_v27  ;;  %584 = vmatpush1.msra.mxu1 %v2433_v28 }
  0x68   :  { %256 = vmatmul.mubr.f32.gmra.mxu0 %v82_v29  ;;  %369 = vmatmul.mubr.f32.gmra.mxu1 %v82_v29  ;;  %v2549_v29 = vld [vmem:[#allocation8 + $0x20] sm:$0xff] }
  0x69   :  { %514 = vmatprep.subr.mxu0 %v2439_v30  ;;  %585 = vmatprep.subr.mxu1 %v2441_v31  ;;  %3446 = vst [vmem:[#allocation32_spill] sm:$0xff] %v2549_v29 }
  0x6a   :  { %515 = vmatpush1.msra.mxu0 %v2445_v32  ;;  %586 = vmatpush1.msra.mxu1 %v2447_v33 }
  0x6b   :  { %516 = vmatprep.subr.mxu0 %v2449_v34  ;;  %587 = vmatprep.subr.mxu1 %v2451_v35 }
  0x6c   :  { %261 = vmatprep.mubr.f32.mxu0 %v3340_v0  ;;  %374 = vmatprep.mubr.f32.mxu1 %v3340_v0 }
  0x6d   :  { %517 = vmatpush1.msra.mxu0 %v2457_v36  ;;  %588 = vmatpush1.msra.mxu1 %v2459_v37 }
  0x6e   :  { %262 = vmatmul.mubr.f32.gmra.mxu0 %v83_v38  ;;  %375 = vmatmul.mubr.f32.gmra.mxu1 %v83_v38  ;;  %v2551_v38 = vld [vmem:[#allocation8 + $0x30] sm:$0xff] }
  0x6f   :  { %518 = vmatprep.subr.mxu0 %v2465_v39  ;;  %589 = vmatprep.subr.mxu1 %v2467_v40  ;;  %3447 = vst [vmem:[#allocation33_spill] sm:$0xff] %v2551_v38 }
  0x70   :  { %519 = vmatpush1.msra.mxu0 %v2471_v41  ;;  %590 = vmatpush1.msra.mxu1 %v2473_v42 }
  0x71   :  { %520 = vmatprep.subr.mxu0 %v2475_v43  ;;  %591 = vmatprep.subr.mxu1 %v2477_v44 }
  0x72   :  { %267 = vmatprep.mubr.f32.mxu0 %v3340_v0  ;;  %380 = vmatprep.mubr.f32.mxu1 %v3340_v0 }
  0x73   :  { %521 = vmatpush1.msra.mxu0 %v2483_v45  ;;  %592 = vmatpush1.msra.mxu1 %v2485_v46 }
  0x74   :  { %268 = vmatmul.mubr.f32.gmra.mxu0 %v84_v47  ;;  %381 = vmatmul.mubr.f32.gmra.mxu1 %v84_v47  ;;  %v2553_v47 = vld [vmem:[#allocation8 + $0x8] sm:$0xff] }
  0x75   :  { %522 = vmatprep.subr.mxu0 %v2491_v48  ;;  %593 = vmatprep.subr.mxu1 %v2493_v49  ;;  %3448 = vst [vmem:[#allocation34_spill] sm:$0xff] %v2553_v47 }
  0x76   :  { %523 = vmatpush1.msra.mxu0 %v2497_v50  ;;  %594 = vmatpush1.msra.mxu1 %v2499_v51 }
  0x77   :  { %524 = vmatprep.subr.mxu0 %v2501_v52  ;;  %595 = vmatprep.subr.mxu1 %v2503_v53 }
  0x78   :  { %273 = vmatprep.mubr.f32.mxu0 %v3340_v0  ;;  %386 = vmatprep.mubr.f32.mxu1 %v3340_v0 }
  0x79   :  { %525 = vmatpush1.msra.mxu0 %v2509_v54  ;;  %596 = vmatpush1.msra.mxu1 %v2511_v55 }
  0x7a   :  { %274 = vmatmul.mubr.f32.gmra.mxu0 %v85_v56  ;;  %387 = vmatmul.mubr.f32.gmra.mxu1 %v85_v56  ;;  %v2555_v56 = vld [vmem:[#allocation8 + $0x18] sm:$0xff] }
  0x7b   :  { %526 = vmatprep.subr.mxu0 %v2517_v57  ;;  %597 = vmatprep.subr.mxu1 %v2519_v58  ;;  %3449 = vst [vmem:[#allocation35_spill] sm:$0xff] %v2555_v56 }
  0x7c   :  { %527 = vmatpush1.msra.mxu0 %v2523_v59  ;;  %598 = vmatpush1.msra.mxu1 %v2525_v60 }
  0x7d   :  { %528 = vmatprep.subr.mxu0 %v2527_v61  ;;  %599 = vmatprep.subr.mxu1 %v2529_v62 }
  0x7e   :  { %279 = vmatprep.mubr.f32.mxu0 %v3340_v0  ;;  %392 = vmatprep.mubr.f32.mxu1 %v3340_v0  ;;  %v2559_v0 = vld [vmem:[#allocation8] sm:$0xff] }
  0x7f   :  { %529 = vmatpush1.msra.mxu0 %v2535_v63  ;;  %600 = vmatpush1.msra.mxu1 %v2537_v1  ;;  %3450 = vst [vmem:[#allocation36_spill] sm:$0xff] %v2559_v0  ;;  %v2563_v1 = vld [vmem:[#allocation8 + $0x10] sm:$0xff] }
  0x80   :  { %280 = vmatmul.mubr.f32.gmra.mxu0 %v86_v2  ;;  %393 = vmatmul.mubr.f32.gmra.mxu1 %v86_v2  ;;  %3451 = vst [vmem:[#allocation37_spill] sm:$0xff] %v2563_v1  ;;  %v3452_v2 = vmov 0.0  }
  0x81   :  { %530 = vmatprep.subr.mxu0 %v2543_v11  ;;  %601 = vmatprep.subr.mxu1 %v2545_v20 }
  0x82   :  { %531 = vmatpush1.msra.mxu0 %v2549_v29  ;;  %602 = vmatpush1.msra.mxu1 %v2551_v38 }
  0x83   :  { %532 = vmatprep.subr.mxu0 %v2553_v47  ;;  %603 = vmatprep.subr.mxu1 %v2555_v56 }
  0x84   :  { %533 = vmatpush1.msra.mxu0 %v2559_v0  ;;  %566 = vmatprep.mubr.f32.mxu0 %v3452_v2 }
  0x85   :  { %604 = vmatpush1.msra.mxu1 %v2563_v1  ;;  %637 = vmatprep.mubr.f32.mxu1 %v3452_v2 }
  0x86   :  { %567 = vmatmul.mubr.f32.vlgmr.msra.gmra.mxu0 %v3452_v2  ;;  %638 = vmatmul.mubr.f32.vlgmr.msra.gmra.mxu1 %v3452_v2 }
  0x87   :  { %673 = vmatprep.subr.mxu0 %v2363_v3  ;;  %744 = vmatprep.subr.mxu1 %v2365_v4 }
  0x88   :  { %674 = vmatpush1.msra.mxu0 %v2367_v5  ;;  %745 = vmatpush1.msra.mxu1 %v2369_v6 }
  0x89   :  { %675 = vmatprep.subr.mxu0 %v2371_v7  ;;  %746 = vmatprep.subr.mxu1 %v2373_v8 }
  0x8a   :  { %676 = vmatpush1.msra.mxu0 %v2379_v9  ;;  %747 = vmatpush1.msra.mxu1 %v2381_v10 }
  0x8b   :  { %677 = vmatprep.subr.mxu0 %v2387_v12  ;;  %748 = vmatprep.subr.mxu1 %v2389_v13 }
  0x8c   :  { %678 = vmatpush1.msra.mxu0 %v2393_v14  ;;  %749 = vmatpush1.msra.mxu1 %v2395_v15 }
  0x8d   :  { %679 = vmatprep.subr.mxu0 %v2397_v16  ;;  %750 = vmatprep.subr.mxu1 %v2399_v17 }
  0x8e   :  { %680 = vmatpush1.msra.mxu0 %v2405_v18  ;;  %751 = vmatpush1.msra.mxu1 %v2407_v19 }
  0x8f   :  { %681 = vmatprep.subr.mxu0 %v2413_v21  ;;  %752 = vmatprep.subr.mxu1 %v2415_v22 }
  0x90   :  { %682 = vmatpush1.msra.mxu0 %v2419_v23  ;;  %753 = vmatpush1.msra.mxu1 %v2421_v24 }
  0x91   :  { %683 = vmatprep.subr.mxu0 %v2423_v25  ;;  %754 = vmatprep.subr.mxu1 %v2425_v26 }
  0x92   :  { %684 = vmatpush1.msra.mxu0 %v2431_v27  ;;  %755 = vmatpush1.msra.mxu1 %v2433_v28 }
  0x93   :  { %685 = vmatprep.subr.mxu0 %v2439_v30  ;;  %756 = vmatprep.subr.mxu1 %v2441_v31 }
  0x94   :  { %686 = vmatpush1.msra.mxu0 %v2445_v32  ;;  %757 = vmatpush1.msra.mxu1 %v2447_v33 }
  0x95   :  { %687 = vmatprep.subr.mxu0 %v2449_v34  ;;  %758 = vmatprep.subr.mxu1 %v2451_v35 }
  0x96   :  { %688 = vmatpush1.msra.mxu0 %v2457_v36  ;;  %759 = vmatpush1.msra.mxu1 %v2459_v37 }
  0x97   :  { %689 = vmatprep.subr.mxu0 %v2465_v39  ;;  %760 = vmatprep.subr.mxu1 %v2467_v40 }
  0x98   :  { %690 = vmatpush1.msra.mxu0 %v2471_v41  ;;  %761 = vmatpush1.msra.mxu1 %v2473_v42 }
  0x99   :  { %691 = vmatprep.subr.mxu0 %v2475_v43  ;;  %762 = vmatprep.subr.mxu1 %v2477_v44 }
  0x9a   :  { %692 = vmatpush1.msra.mxu0 %v2483_v45  ;;  %763 = vmatpush1.msra.mxu1 %v2485_v46 }
  0x9b   :  { %693 = vmatprep.subr.mxu0 %v2491_v48  ;;  %764 = vmatprep.subr.mxu1 %v2493_v49 }
  0x9c   :  { %694 = vmatpush1.msra.mxu0 %v2497_v50  ;;  %765 = vmatpush1.msra.mxu1 %v2499_v51 }
  0x9d   :  { %695 = vmatprep.subr.mxu0 %v2501_v52  ;;  %766 = vmatprep.subr.mxu1 %v2503_v53  ;;  %v3453_v52 = vld [vmem:[#allocation29_spill] sm:$0xff] }
  0x9e   :  { %696 = vmatpush1.msra.mxu0 %v2509_v54  ;;  %767 = vmatpush1.msra.mxu1 %v2511_v55 }
  0x9f   :  { %697 = vmatprep.subr.mxu0 %v2517_v57  ;;  %768 = vmatprep.subr.mxu1 %v2519_v58 }
  0xa0   :  { %698 = vmatpush1.msra.mxu0 %v2523_v59  ;;  %769 = vmatpush1.msra.mxu1 %v2525_v60 }
  0xa1   :  { %699 = vmatprep.subr.mxu0 %v2527_v61  ;;  %770 = vmatprep.subr.mxu1 %v2529_v62 }
  0xa2   :  { %700 = vmatpush1.msra.mxu0 %v2535_v63  ;;  %771 = vmatpush1.msra.mxu1 %v3453_v52 }
  0xa3   :  { %701 = vmatprep.subr.mxu0 %v2543_v11  ;;  %772 = vmatprep.subr.mxu1 %v2545_v20  ;;  %v153_v20 = vlaneseq }
  0xa4   :  { %702 = vmatpush1.msra.mxu0 %v2549_v29  ;;  %773 = vmatpush1.msra.mxu1 %v2551_v38 }
  0xa5   :  { %703 = vmatprep.subr.mxu0 %v2553_v47  ;;  %774 = vmatprep.subr.mxu1 %v2555_v56  ;;  %v154_v29 = vshrl.u32 %v153_v20, 7 }
  0xa6   :  { %704 = vmatpush1.msra.mxu0 %v2559_v0  ;;  %737 = vmatprep.mubr.f32.mxu0 %v3452_v2  ;;  %v151_v0 = vld [vmem:[%s3336_s3] sm:$0xf] }
  0xa7   :  { %775 = vmatpush1.msra.mxu1 %v2563_v1  ;;  %808 = vmatprep.mubr.f32.mxu1 %v3452_v2  ;;  %v155_v47 = vsub.s32 0, %v154_v29  ;;  %v163_v56 = vsub.s32 2, %v154_v29  ;;  %v159_v2 = vsub.s32 1, %v154_v29 }
  0xa8   :  { %844 = vmatprep.subr.mxu0 %v2363_v3  ;;  %915 = vmatprep.subr.mxu1 %v2365_v4  ;;  %v167_v3 = vsub.s32 3, %v154_v29 }
  0xa9   :  { %v156_v63 = vrot.slane %v151_v0, %v155_v47  ;;  %v2652_v4 = vrot.slane %v151_v0, %v163_v56  ;;  %v160_v61 = vrot.slane %v151_v0, %v159_v2 }
  0xaa   :  { %v2654_v60 = vrot.slane %v151_v0, %v167_v3 }
 0x116   :  { %v2641_v11 = vpop.f32.mrf.mxu0  ;;  %v2643_v38 = vpop.f32.mrf.mxu1 }
 0x118   :  { %v2648_v52 = vpop.f32.mrf.mxu0  ;;  %v2650_v1 = vpop.f32.mrf.mxu1 }
 0x11c   :  { %v245_v20 = vpop.f32.mrf.mxu0  ;;  %v358_v62 = vpop.f32.mrf.mxu1 }
 0x11d   :  { %v2656_v59 = vadd.f32 %v245_v20, %v156_v63  ;;  %v2659_v58 = vadd.f32 %v358_v62, %v2652_v4 }
 0x11e   :  { %v247_v57 = vpop.f32.mrf.mxu0  ;;  %v360_v55 = vpop.f32.mrf.mxu1 }
 0x11f   :  { %3454 = vst [vmem:[#allocation38_spill] sm:$0xff] %v2656_v59  ;;  %3455 = vst [vmem:[#allocation39_spill] sm:$0xff] %v2659_v58  ;;  %v2661_v54 = vadd.f32 %v247_v57, %v160_v61  ;;  %v2664_v53 = vadd.f32 %v360_v55, %v2654_v60 }
 0x121   :  { %3456 = vst [vmem:[#allocation40_spill] sm:$0xff] %v2661_v54  ;;  %3457 = vst [vmem:[#allocation41_spill] sm:$0xff] %v2664_v53 }
 0x122   :  { %v251_v29 = vpop.f32.mrf.mxu0  ;;  %v364_v47 = vpop.f32.mrf.mxu1 }
 0x123   :  { %v2666_v56 = vadd.f32 %v251_v29, %v156_v63  ;;  %v2669_v2 = vadd.f32 %v364_v47, %v2652_v4 }
 0x124   :  { %v253_v0 = vpop.f32.mrf.mxu0  ;;  %v366_v3 = vpop.f32.mrf.mxu1 }
 0x125   :  { %3458 = vst [vmem:[#allocation42_spill] sm:$0xff] %v2666_v56  ;;  %3459 = vst [vmem:[#allocation43_spill] sm:$0xff] %v2669_v2  ;;  %v2671_v20 = vadd.f32 %v253_v0, %v160_v61  ;;  %v2674_v62 = vadd.f32 %v366_v3, %v2654_v60 }
 0x127   :  { %3460 = vst [vmem:[#allocation44_spill] sm:$0xff] %v2671_v20  ;;  %3461 = vst [vmem:[#allocation45_spill] sm:$0xff] %v2674_v62 }
 0x128   :  { %v257_v58 = vpop.f32.mrf.mxu0  ;;  %v370_v57 = vpop.f32.mrf.mxu1 }
 0x129   :  { %v2676_v54 = vadd.f32 %v257_v58, %v156_v63  ;;  %v2679_v55 = vadd.f32 %v370_v57, %v2652_v4 }
 0x12a   :  { %v259_v53 = vpop.f32.mrf.mxu0  ;;  %v372_v29 = vpop.f32.mrf.mxu1 }
 0x12b   :  { %3462 = vst [vmem:[#allocation46_spill] sm:$0xff] %v2676_v54  ;;  %3463 = vst [vmem:[#allocation47_spill] sm:$0xff] %v2679_v55  ;;  %v2681_v56 = vadd.f32 %v259_v53, %v160_v61  ;;  %v2684_v47 = vadd.f32 %v372_v29, %v2654_v60 }
 0x12d   :  { %3464 = vst [vmem:[#allocation48_spill] sm:$0xff] %v2681_v56  ;;  %3465 = vst [vmem:[#allocation49_spill] sm:$0xff] %v2684_v47 }
 0x12e   :  { %v263_v2 = vpop.f32.mrf.mxu0  ;;  %v376_v0 = vpop.f32.mrf.mxu1 }
 0x12f   :  { %v2686_v20 = vadd.f32 %v263_v2, %v156_v63  ;;  %v2689_v3 = vadd.f32 %v376_v0, %v2652_v4 }
 0x130   :  { %v265_v62 = vpop.f32.mrf.mxu0  ;;  %v378_v58 = vpop.f32.mrf.mxu1 }
 0x131   :  { %3466 = vst [vmem:[#allocation50_spill] sm:$0xff] %v2686_v20  ;;  %3467 = vst [vmem:[#allocation51_spill] sm:$0xff] %v2689_v3  ;;  %v2691_v54 = vadd.f32 %v265_v62, %v160_v61  ;;  %v2694_v57 = vadd.f32 %v378_v58, %v2654_v60 }
 0x133   :  { %3468 = vst [vmem:[#allocation52_spill] sm:$0xff] %v2691_v54  ;;  %3469 = vst [vmem:[#allocation53_spill] sm:$0xff] %v2694_v57 }
 0x134   :  { %v269_v55 = vpop.f32.mrf.mxu0  ;;  %v382_v53 = vpop.f32.mrf.mxu1 }
 0x135   :  { %v2696_v56 = vadd.f32 %v269_v55, %v156_v63  ;;  %v2699_v29 = vadd.f32 %v382_v53, %v2652_v4 }
 0x136   :  { %v271_v47 = vpop.f32.mrf.mxu0  ;;  %v384_v2 = vpop.f32.mrf.mxu1 }
 0x137   :  { %3470 = vst [vmem:[#allocation54_spill] sm:$0xff] %v2696_v56  ;;  %3471 = vst [vmem:[#allocation55_spill] sm:$0xff] %v2699_v29  ;;  %v2701_v20 = vadd.f32 %v271_v47, %v160_v61  ;;  %v2704_v0 = vadd.f32 %v384_v2, %v2654_v60 }
 0x139   :  { %3472 = vst [vmem:[#allocation56_spill] sm:$0xff] %v2701_v20  ;;  %3473 = vst [vmem:[#allocation57_spill] sm:$0xff] %v2704_v0 }
 0x13a   :  { %v275_v3 = vpop.f32.mrf.mxu0  ;;  %v388_v62 = vpop.f32.mrf.mxu1 }
 0x13b   :  { %v2706_v54 = vadd.f32 %v275_v3, %v156_v63  ;;  %v2709_v58 = vadd.f32 %v388_v62, %v2652_v4 }
 0x13c   :  { %v277_v57 = vpop.f32.mrf.mxu0  ;;  %v390_v55 = vpop.f32.mrf.mxu1 }
 0x13d   :  { %3474 = vst [vmem:[#allocation58_spill] sm:$0xff] %v2706_v54  ;;  %3475 = vst [vmem:[#allocation59_spill] sm:$0xff] %v2709_v58  ;;  %v2711_v56 = vadd.f32 %v277_v57, %v160_v61  ;;  %v2714_v53 = vadd.f32 %v390_v55, %v2654_v60  ;;  %v240_v57 = vadd.f32 %v2641_v11, %v156_v63 }
 0x13e   :  { %v242_v55 = vadd.f32 %v2648_v52, %v160_v61 }
 0x13f   :  { %3476 = vst [vmem:[#allocation60_spill] sm:$0xff] %v2711_v56  ;;  %3477 = vst [vmem:[#allocation61_spill] sm:$0xff] %v2714_v53 }
 0x140   :  { %v281_v29 = vpop.f32.mrf.mxu0  ;;  %v394_v47 = vpop.f32.mrf.mxu1 }
 0x141   :  { %v2716_v20 = vadd.f32 %v281_v29, %v156_v63  ;;  %v2719_v2 = vadd.f32 %v394_v47, %v2652_v4  ;;  %v353_v47 = vadd.f32 %v2643_v38, %v2652_v4 }
 0x142   :  { %v283_v0 = vpop.f32.mrf.mxu0  ;;  %v396_v3 = vpop.f32.mrf.mxu1 }
 0x143   :  { %3478 = vst [vmem:[#allocation62_spill] sm:$0xff] %v2716_v20  ;;  %3479 = vst [vmem:[#allocation63_spill] sm:$0xff] %v2719_v2  ;;  %v2721_v54 = vadd.f32 %v283_v0, %v160_v61  ;;  %v2724_v62 = vadd.f32 %v396_v3, %v2654_v60  ;;  %v355_v3 = vadd.f32 %v2650_v1, %v2654_v60 }
 0x145   :  { %3480 = vst [vmem:[#allocation64_spill] sm:$0xff] %v2721_v54  ;;  %3481 = vst [vmem:[#allocation65_spill] sm:$0xff] %v2724_v62  ;;  %v3502_v62 = vld [vmem:[#allocation37_spill] sm:$0xff] }
 0x146   :  { %v568_v58 = vpop.f32.mrf.mxu0  ;;  %v639_v20 = vpop.f32.mrf.mxu1 }
 0x147   :  { %v644_v53 = vadd.f32 %v568_v58, %v240_v57  ;;  %v646_v0 = vadd.f32 %v639_v20, %v353_v47  ;;  %v3483_v47 = vld [vmem:[#allocation19_spill] sm:$0xff] }
 0x148   :  { %v570_v56 = vpop.f32.mrf.mxu0  ;;  %v641_v54 = vpop.f32.mrf.mxu1 }
 0x149   :  { %v648_v59 = vmul.f32 0.5, %v644_v53  ;;  %v645_v29 = vadd.f32 %v570_v56, %v242_v55  ;;  %v647_v63 = vadd.f32 %v641_v54, %v355_v3  ;;  %v3485_v3 = vld [vmem:[#allocation21_spill] sm:$0xff] }
 0x14b   :  { %2045 = vtanh.f32 %v648_v59  ;;  %v649_v2 = vmul.f32 0.5, %v645_v29  ;;  %v657_v11 = vmul.f32 0.5, %v647_v63  ;;  %v3482_v29 = vld [vmem:[#allocation18_spill] sm:$0xff] }
 0x14c   :  { %v3486_v63 = vld [vmem:[#allocation22_spill] sm:$0xff] }
 0x14d   :  { %2047 = vtanh.f32 %v649_v2 }
 0x14e   :  { %2049 = vtanh.f32 %v646_v0  ;;  %v3484_v0 = vld [vmem:[#allocation20_spill] sm:$0xff] }
 0x14f   :  { %2051 = vtanh.f32 %v657_v11  ;;  %v3487_v11 = vld [vmem:[#allocation23_spill] sm:$0xff] }
 0x158   :  { %v2046_v52 = vpop.eup %2045 }
 0x159   :  { %v652_v61 = vmul.f32 0.5, %v2046_v52  ;;  %v3488_v52 = vld [vmem:[#allocation24_spill] sm:$0xff] }
 0x15a   :  { %v2048_v58 = vpop.eup %2047 }
 0x15b   :  { %v654_v53 = vadd.f32 0.5, %v652_v61  ;;  %v653_v56 = vmul.f32 0.5, %v2048_v58  ;;  %v2050_v55 = vpop.eup %2049  ;;  %v3489_v61 = vld [vmem:[#allocation25_spill] sm:$0xff]  ;;  %v3490_v58 = vld [vmem:[#allocation26_spill] sm:$0xff] }
 0x15c   :  { %v2052_v20 = vpop.eup %2051 }
 0x15d   :  { %v655_v57 = vadd.f32 0.5, %v653_v56  ;;  %v662_v59 = vmul.f32 %v2050_v55, %v654_v53  ;;  %v659_v2 = vmul.f32 0.5, %v2052_v20  ;;  %v3491_v53 = vld [vmem:[#allocation27_spill] sm:$0xff]  ;;  %v3492_v56 = vld [vmem:[#allocation28_spill] sm:$0xff]  ;;  %v3494_v55 = vld [vmem:[#allocation30_spill] sm:$0xff] }
 0x15e   :  { %v3497_v20 = vld [vmem:[#allocation33_spill] sm:$0xff] }
 0x15f   :  { %v661_v4 = vmul.f32 0.0, %v655_v57  ;;  %v660_v60 = vadd.f32 0.5, %v659_v2  ;;  %v3493_v57 = vld [vmem:[#allocation29_spill] sm:$0xff]  ;;  %v3498_v2 = vld [vmem:[#allocation34_spill] sm:$0xff] }
 0x161   :  { %v2732_v38 = vadd.f32 %v662_v59, %v661_v4  ;;  %v3495_v4 = vld [vmem:[#allocation31_spill] sm:$0xff]  ;;  %v3496_v59 = vld [vmem:[#allocation32_spill] sm:$0xff] }
 0x163   :  { %2053 = vtanh.f32 %v2732_v38 }
 0x170   :  { %v2054_v1 = vpop.eup %2053 }
 0x171   :  { %v665_v54 = vmul.f32 %v2054_v1, %v660_v60  ;;  %v3499_v60 = vld [vmem:[#allocation35_spill] sm:$0xff]  ;;  %v3500_v1 = vld [vmem:[#allocation36_spill] sm:$0xff] }
 0x173   :  { %738 = vmatmul.mubr.f32.vlgmr.msra.gmra.mxu0 %v665_v54  ;;  %809 = vmatmul.mubr.f32.vlgmr.msra.gmra.mxu1 %v665_v54  ;;  %v3501_v54 = vmov 0.0  }
 0x174   :  { %845 = vmatpush1.msra.mxu0 %v2367_v5  ;;  %916 = vmatpush1.msra.mxu1 %v2369_v6 }
 0x175   :  { %846 = vmatprep.subr.mxu0 %v2371_v7  ;;  %917 = vmatprep.subr.mxu1 %v2373_v8 }
 0x176   :  { %847 = vmatpush1.msra.mxu0 %v2379_v9  ;;  %918 = vmatpush1.msra.mxu1 %v2381_v10 }
 0x177   :  { %848 = vmatprep.subr.mxu0 %v2387_v12  ;;  %919 = vmatprep.subr.mxu1 %v2389_v13 }
 0x178   :  { %849 = vmatpush1.msra.mxu0 %v2393_v14  ;;  %920 = vmatpush1.msra.mxu1 %v2395_v15 }
 0x179   :  { %850 = vmatprep.subr.mxu0 %v2397_v16  ;;  %921 = vmatprep.subr.mxu1 %v2399_v17 }
 0x17a   :  { %851 = vmatpush1.msra.mxu0 %v2405_v18  ;;  %922 = vmatpush1.msra.mxu1 %v2407_v19 }
 0x17b   :  { %852 = vmatprep.subr.mxu0 %v2413_v21  ;;  %923 = vmatprep.subr.mxu1 %v2415_v22 }
 0x17c   :  { %853 = vmatpush1.msra.mxu0 %v2419_v23  ;;  %924 = vmatpush1.msra.mxu1 %v2421_v24 }
 0x17d   :  { %854 = vmatprep.subr.mxu0 %v2423_v25  ;;  %925 = vmatprep.subr.mxu1 %v2425_v26 }
 0x17e   :  { %855 = vmatpush1.msra.mxu0 %v2431_v27  ;;  %926 = vmatpush1.msra.mxu1 %v2433_v28 }
 0x17f   :  { %856 = vmatprep.subr.mxu0 %v2439_v30  ;;  %927 = vmatprep.subr.mxu1 %v2441_v31 }
 0x180   :  { %857 = vmatpush1.msra.mxu0 %v2445_v32  ;;  %928 = vmatpush1.msra.mxu1 %v2447_v33 }
 0x181   :  { %858 = vmatprep.subr.mxu0 %v2449_v34  ;;  %929 = vmatprep.subr.mxu1 %v2451_v35 }
 0x182   :  { %859 = vmatpush1.msra.mxu0 %v2457_v36  ;;  %930 = vmatpush1.msra.mxu1 %v2459_v37 }
 0x183   :  { %860 = vmatprep.subr.mxu0 %v2465_v39  ;;  %931 = vmatprep.subr.mxu1 %v2467_v40 }
 0x184   :  { %861 = vmatpush1.msra.mxu0 %v2471_v41  ;;  %932 = vmatpush1.msra.mxu1 %v2473_v42 }
 0x185   :  { %862 = vmatprep.subr.mxu0 %v2475_v43  ;;  %933 = vmatprep.subr.mxu1 %v2477_v44 }
 0x186   :  { %863 = vmatpush1.msra.mxu0 %v2483_v45  ;;  %934 = vmatpush1.msra.mxu1 %v2485_v46 }
 0x187   :  { %864 = vmatprep.subr.mxu0 %v2491_v48  ;;  %935 = vmatprep.subr.mxu1 %v2493_v49 }
 0x188   :  { %865 = vmatpush1.msra.mxu0 %v2497_v50  ;;  %936 = vmatpush1.msra.mxu1 %v2499_v51 }
 0x189   :  { %866 = vmatprep.subr.mxu0 %v3482_v29  ;;  %937 = vmatprep.subr.mxu1 %v3483_v47 }
 0x18a   :  { %867 = vmatpush1.msra.mxu0 %v3484_v0  ;;  %938 = vmatpush1.msra.mxu1 %v3485_v3 }
 0x18b   :  { %868 = vmatprep.subr.mxu0 %v3486_v63  ;;  %939 = vmatprep.subr.mxu1 %v3487_v11 }
 0x18c   :  { %869 = vmatpush1.msra.mxu0 %v3488_v52  ;;  %940 = vmatpush1.msra.mxu1 %v3489_v61 }
 0x18d   :  { %870 = vmatprep.subr.mxu0 %v3490_v58  ;;  %941 = vmatprep.subr.mxu1 %v3491_v53  ;;  %v3506_v58 = vld [vmem:[#allocation40_spill] sm:$0xff] }
 0x18e   :  { %871 = vmatpush1.msra.mxu0 %v3492_v56  ;;  %942 = vmatpush1.msra.mxu1 %v3493_v57  ;;  %v3503_v57 = vld [vmem:[#allocation16_spill] sm:$0xff] }
 0x18f   :  { %872 = vmatprep.subr.mxu0 %v3494_v55  ;;  %943 = vmatprep.subr.mxu1 %v3495_v4  ;;  %v3504_v55 = vld [vmem:[#allocation17_spill] sm:$0xff] }
 0x190   :  { %873 = vmatpush1.msra.mxu0 %v3496_v59  ;;  %944 = vmatpush1.msra.mxu1 %v3497_v20  ;;  %v3505_v59 = vld [vmem:[#allocation38_spill] sm:$0xff] }
 0x191   :  { %874 = vmatprep.subr.mxu0 %v3498_v2  ;;  %945 = vmatprep.subr.mxu1 %v3499_v60 }
 0x192   :  { %875 = vmatpush1.msra.mxu0 %v3500_v1  ;;  %908 = vmatprep.mubr.f32.mxu0 %v3501_v54  ;;  %v3507_v1 = vld [vmem:[#allocation39_spill] sm:$0xff] }
 0x193   :  { %946 = vmatpush1.msra.mxu1 %v3502_v62  ;;  %979 = vmatprep.mubr.f32.mxu1 %v3501_v54  ;;  %v3508_v54 = vld [vmem:[#allocation41_spill] sm:$0xff] }
 0x194   :  { %1015 = vmatprep.subr.mxu0 %v3503_v57  ;;  %1086 = vmatprep.subr.mxu1 %v3504_v55 }
 0x233   :  { %v739_v4 = vpop.f32.mrf.mxu0  ;;  %v810_v20 = vpop.f32.mrf.mxu1 }
 0x234   :  { %v815_v56 = vadd.f32 %v739_v4, %v3505_v59  ;;  %v817_v61 = vadd.f32 %v810_v20, %v3507_v1 }
 0x235   :  { %v741_v53 = vpop.f32.mrf.mxu0  ;;  %v812_v62 = vpop.f32.mrf.mxu1 }
 0x236   :  { %v819_v2 = vmul.f32 0.5, %v815_v56  ;;  %v816_v60 = vadd.f32 %v741_v53, %v3506_v58  ;;  %v818_v11 = vadd.f32 %v812_v62, %v3508_v54  ;;  %v3533_v54 = vld [vmem:[#allocation43_spill] sm:$0xff] }
 0x238   :  { %2055 = vtanh.f32 %v819_v2  ;;  %v820_v52 = vmul.f32 0.5, %v816_v60  ;;  %v828_v57 = vmul.f32 0.5, %v818_v11  ;;  %v3532_v60 = vld [vmem:[#allocation44_spill] sm:$0xff] }
 0x23a   :  { %2057 = vtanh.f32 %v820_v52 }
 0x23b   :  { %2059 = vtanh.f32 %v817_v61 }
 0x23c   :  { %2061 = vtanh.f32 %v828_v57 }
 0x245   :  { %v2056_v63 = vpop.eup %2055 }
 0x246   :  { %v823_v55 = vmul.f32 0.5, %v2056_v63 }
 0x247   :  { %v2058_v3 = vpop.eup %2057 }
 0x248   :  { %v825_v0 = vadd.f32 0.5, %v823_v55  ;;  %v824_v4 = vmul.f32 0.5, %v2058_v3  ;;  %v2060_v59 = vpop.eup %2059  ;;  %v3531_v3 = vld [vmem:[#allocation42_spill] sm:$0xff] }
 0x249   :  { %v2062_v52 = vpop.eup %2061 }
 0x24a   :  { %v826_v56 = vadd.f32 0.5, %v824_v4  ;;  %v833_v47 = vmul.f32 %v2060_v59, %v825_v0  ;;  %v830_v61 = vmul.f32 0.5, %v2062_v52 }
 0x24c   :  { %v832_v58 = vmul.f32 %v826_v56, %v2732_v38  ;;  %v831_v20 = vadd.f32 0.5, %v830_v61  ;;  %v3529_v38 = vld [vmem:[#allocation16_spill] sm:$0xff] }
 0x24e   :  { %v2806_v53 = vadd.f32 %v833_v47, %v832_v58  ;;  %v3530_v47 = vld [vmem:[#allocation17_spill] sm:$0xff] }
 0x24f   :  { %v3534_v58 = vld [vmem:[#allocation45_spill] sm:$0xff] }
 0x250   :  { %2063 = vtanh.f32 %v2806_v53 }
 0x25d   :  { %v2064_v62 = vpop.eup %2063 }
 0x25e   :  { %v836_v11 = vmul.f32 %v2064_v62, %v831_v20 }
 0x260   :  { %909 = vmatmul.mubr.f32.vlgmr.msra.gmra.mxu0 %v836_v11  ;;  %980 = vmatmul.mubr.f32.vlgmr.msra.gmra.mxu1 %v836_v11 }
 0x261   :  { %1016 = vmatpush1.msra.mxu0 %v2367_v5  ;;  %1087 = vmatpush1.msra.mxu1 %v2369_v6  ;;  %v3509_v5 = vld [vmem:[#allocation19_spill] sm:$0xff]  ;;  %v3510_v6 = vld [vmem:[#allocation20_spill] sm:$0xff] }
 0x262   :  { %1017 = vmatprep.subr.mxu0 %v2371_v7  ;;  %1088 = vmatprep.subr.mxu1 %v2373_v8  ;;  %v3511_v7 = vld [vmem:[#allocation21_spill] sm:$0xff]  ;;  %v3512_v8 = vld [vmem:[#allocation22_spill] sm:$0xff] }
 0x263   :  { %1018 = vmatpush1.msra.mxu0 %v2379_v9  ;;  %1089 = vmatpush1.msra.mxu1 %v2381_v10  ;;  %v3513_v9 = vld [vmem:[#allocation23_spill] sm:$0xff]  ;;  %v3514_v10 = vld [vmem:[#allocation24_spill] sm:$0xff] }
 0x264   :  { %1019 = vmatprep.subr.mxu0 %v2387_v12  ;;  %1090 = vmatprep.subr.mxu1 %v2389_v13  ;;  %v3515_v12 = vld [vmem:[#allocation25_spill] sm:$0xff]  ;;  %v3516_v13 = vld [vmem:[#allocation26_spill] sm:$0xff] }
 0x265   :  { %1020 = vmatpush1.msra.mxu0 %v2393_v14  ;;  %1091 = vmatpush1.msra.mxu1 %v2395_v15  ;;  %v3517_v14 = vld [vmem:[#allocation27_spill] sm:$0xff]  ;;  %v3518_v15 = vld [vmem:[#allocation28_spill] sm:$0xff] }
 0x266   :  { %1021 = vmatprep.subr.mxu0 %v2397_v16  ;;  %1092 = vmatprep.subr.mxu1 %v2399_v17  ;;  %v3519_v16 = vld [vmem:[#allocation29_spill] sm:$0xff]  ;;  %v3520_v17 = vld [vmem:[#allocation30_spill] sm:$0xff] }
 0x267   :  { %1022 = vmatpush1.msra.mxu0 %v2405_v18  ;;  %1093 = vmatpush1.msra.mxu1 %v2407_v19  ;;  %v3521_v18 = vld [vmem:[#allocation31_spill] sm:$0xff]  ;;  %v3522_v19 = vld [vmem:[#allocation32_spill] sm:$0xff] }
 0x268   :  { %1023 = vmatprep.subr.mxu0 %v2413_v21  ;;  %1094 = vmatprep.subr.mxu1 %v2415_v22  ;;  %v3523_v21 = vld [vmem:[#allocation33_spill] sm:$0xff]  ;;  %v3524_v22 = vld [vmem:[#allocation34_spill] sm:$0xff] }
 0x269   :  { %1024 = vmatpush1.msra.mxu0 %v2419_v23  ;;  %1095 = vmatpush1.msra.mxu1 %v2421_v24  ;;  %v3525_v23 = vld [vmem:[#allocation35_spill] sm:$0xff]  ;;  %v3526_v24 = vld [vmem:[#allocation36_spill] sm:$0xff] }
 0x26a   :  { %1025 = vmatprep.subr.mxu0 %v2423_v25  ;;  %1096 = vmatprep.subr.mxu1 %v2425_v26  ;;  %v3527_v25 = vmov 0.0   ;;  %v3528_v26 = vld [vmem:[#allocation37_spill] sm:$0xff] }
 0x26b   :  { %1026 = vmatpush1.msra.mxu0 %v2431_v27  ;;  %1097 = vmatpush1.msra.mxu1 %v2433_v28 }
 0x26c   :  { %1027 = vmatprep.subr.mxu0 %v2439_v30  ;;  %1098 = vmatprep.subr.mxu1 %v2441_v31 }
 0x26d   :  { %1028 = vmatpush1.msra.mxu0 %v2445_v32  ;;  %1099 = vmatpush1.msra.mxu1 %v2447_v33 }
 0x26e   :  { %1029 = vmatprep.subr.mxu0 %v2449_v34  ;;  %1100 = vmatprep.subr.mxu1 %v2451_v35 }
 0x26f   :  { %1030 = vmatpush1.msra.mxu0 %v2457_v36  ;;  %1101 = vmatpush1.msra.mxu1 %v2459_v37 }
 0x270   :  { %1031 = vmatprep.subr.mxu0 %v2465_v39  ;;  %1102 = vmatprep.subr.mxu1 %v2467_v40 }
 0x271   :  { %1032 = vmatpush1.msra.mxu0 %v2471_v41  ;;  %1103 = vmatpush1.msra.mxu1 %v2473_v42 }
 0x272   :  { %1033 = vmatprep.subr.mxu0 %v2475_v43  ;;  %1104 = vmatprep.subr.mxu1 %v2477_v44 }
 0x273   :  { %1034 = vmatpush1.msra.mxu0 %v2483_v45  ;;  %1105 = vmatpush1.msra.mxu1 %v2485_v46 }
 0x274   :  { %1035 = vmatprep.subr.mxu0 %v2491_v48  ;;  %1106 = vmatprep.subr.mxu1 %v2493_v49 }
 0x275   :  { %1036 = vmatpush1.msra.mxu0 %v2497_v50  ;;  %1107 = vmatpush1.msra.mxu1 %v2499_v51 }
 0x276   :  { %1037 = vmatprep.subr.mxu0 %v3482_v29  ;;  %1108 = vmatprep.subr.mxu1 %v3509_v5 }
 0x277   :  { %1038 = vmatpush1.msra.mxu0 %v3510_v6  ;;  %1109 = vmatpush1.msra.mxu1 %v3511_v7 }
 0x278   :  { %1039 = vmatprep.subr.mxu0 %v3512_v8  ;;  %1110 = vmatprep.subr.mxu1 %v3513_v9 }
 0x279   :  { %1040 = vmatpush1.msra.mxu0 %v3514_v10  ;;  %1111 = vmatpush1.msra.mxu1 %v3515_v12 }
 0x27a   :  { %1041 = vmatprep.subr.mxu0 %v3516_v13  ;;  %1112 = vmatprep.subr.mxu1 %v3517_v14 }
 0x27b   :  { %1042 = vmatpush1.msra.mxu0 %v3518_v15  ;;  %1113 = vmatpush1.msra.mxu1 %v3519_v16 }
 0x27c   :  { %1043 = vmatprep.subr.mxu0 %v3520_v17  ;;  %1114 = vmatprep.subr.mxu1 %v3521_v18 }
 0x27d   :  { %1044 = vmatpush1.msra.mxu0 %v3522_v19  ;;  %1115 = vmatpush1.msra.mxu1 %v3523_v21 }
 0x27e   :  { %1045 = vmatprep.subr.mxu0 %v3524_v22  ;;  %1116 = vmatprep.subr.mxu1 %v3525_v23 }
 0x27f   :  { %1046 = vmatpush1.msra.mxu0 %v3526_v24  ;;  %1079 = vmatprep.mubr.f32.mxu0 %v3527_v25 }
 0x280   :  { %1117 = vmatpush1.msra.mxu1 %v3528_v26  ;;  %1150 = vmatprep.mubr.f32.mxu1 %v3527_v25 }
 0x281   :  { %1186 = vmatprep.subr.mxu0 %v3529_v38  ;;  %1257 = vmatprep.subr.mxu1 %v3530_v47 }
 0x320   :  { %v910_v0 = vpop.f32.mrf.mxu0  ;;  %v981_v57 = vpop.f32.mrf.mxu1 }
 0x321   :  { %v986_v63 = vadd.f32 %v910_v0, %v3531_v3  ;;  %v988_v4 = vadd.f32 %v981_v57, %v3533_v54 }
 0x322   :  { %v912_v55 = vpop.f32.mrf.mxu0  ;;  %v983_v56 = vpop.f32.mrf.mxu1 }
 0x323   :  { %v990_v2 = vmul.f32 0.5, %v986_v63  ;;  %v987_v1 = vadd.f32 %v912_v55, %v3532_v60  ;;  %v989_v52 = vadd.f32 %v983_v56, %v3534_v58  ;;  %v2886_v56 = vld [vmem:[#allocation8 + $0x1f0] sm:$0xff]  ;;  %v2892_v58 = vld [vmem:[#allocation8 + $0x1d8] sm:$0xff] }
 0x325   :  { %2065 = vtanh.f32 %v990_v2  ;;  %v991_v59 = vmul.f32 0.5, %v987_v1  ;;  %v999_v61 = vmul.f32 0.5, %v989_v52  ;;  %v2895_v52 = vld [vmem:[#allocation8 + $0x1c0] sm:$0xff] }
 0x327   :  { %2067 = vtanh.f32 %v991_v59  ;;  %v2883_v59 = vld [vmem:[#allocation8 + $0x1e0] sm:$0xff] }
 0x328   :  { %2069 = vtanh.f32 %v988_v4 }
 0x329   :  { %2071 = vtanh.f32 %v999_v61  ;;  %v2898_v61 = vld [vmem:[#allocation8 + $0x1d0] sm:$0xff] }
 0x332   :  { %v2066_v20 = vpop.eup %2065 }
 0x333   :  { %v994_v62 = vmul.f32 0.5, %v2066_v20  ;;  %v2901_v20 = vld [vmem:[#allocation8 + $0x1a8] sm:$0xff] }
 0x334   :  { %v2068_v11 = vpop.eup %2067 }
 0x335   :  { %v996_v38 = vadd.f32 0.5, %v994_v62  ;;  %v995_v47 = vmul.f32 0.5, %v2068_v11  ;;  %v2070_v0 = vpop.eup %2069  ;;  %v2904_v62 = vld [vmem:[#allocation8 + $0x1b8] sm:$0xff]  ;;  %v2907_v11 = vld [vmem:[#allocation8 + $0x1a0] sm:$0xff] }
 0x336   :  { %v2072_v57 = vpop.eup %2071 }
 0x337   :  { %v997_v3 = vadd.f32 0.5, %v995_v47  ;;  %v1004_v63 = vmul.f32 %v2070_v0, %v996_v38  ;;  %v1001_v60 = vmul.f32 0.5, %v2072_v57  ;;  %v2910_v38 = vld [vmem:[#allocation8 + $0x1b0] sm:$0xff]  ;;  %v2913_v47 = vld [vmem:[#allocation8 + $0x188] sm:$0xff]  ;;  %v2916_v0 = vld [vmem:[#allocation8 + $0x198] sm:$0xff] }
 0x338   :  { %v2928_v57 = vld [vmem:[#allocation8 + $0x178] sm:$0xff] }
 0x339   :  { %v1003_v55 = vmul.f32 %v997_v3, %v2806_v53  ;;  %v1002_v1 = vadd.f32 0.5, %v1001_v60  ;;  %v2889_v53 = vld [vmem:[#allocation8 + $0x1c8] sm:$0xff]  ;;  %v2919_v3 = vld [vmem:[#allocation8 + $0x180] sm:$0xff] }
 0x33a   :  { %v2931_v60 = vld [vmem:[#allocation8 + $0x160] sm:$0xff] }
 0x33b   :  { %v2880_v2 = vadd.f32 %v1004_v63, %v1003_v55  ;;  %v2922_v63 = vld [vmem:[#allocation8 + $0x190] sm:$0xff]  ;;  %v2925_v55 = vld [vmem:[#allocation8 + $0x168] sm:$0xff] }
 0x33d   :  { %2073 = vtanh.f32 %v2880_v2 }
 0x34a   :  { %v2074_v54 = vpop.eup %2073 }
 0x34b   :  { %v1007_v4 = vmul.f32 %v2074_v54, %v1002_v1  ;;  %v2934_v1 = vld [vmem:[#allocation8 + $0x170] sm:$0xff]  ;;  %v2937_v54 = vld [vmem:[#allocation8 + $0x148] sm:$0xff] }
 0x34d   :  { %1080 = vmatmul.mubr.f32.vlgmr.msra.gmra.mxu0 %v1007_v4  ;;  %1151 = vmatmul.mubr.f32.vlgmr.msra.gmra.mxu1 %v1007_v4  ;;  %v2940_v4 = vld [vmem:[#allocation8 + $0x158] sm:$0xff] }
 0x34e   :  { %1187 = vmatpush1.msra.mxu0 %v2883_v59  ;;  %1258 = vmatpush1.msra.mxu1 %v2886_v56 }
 0x34f   :  { %1188 = vmatprep.subr.mxu0 %v2889_v53  ;;  %1259 = vmatprep.subr.mxu1 %v2892_v58 }
 0x350   :  { %1189 = vmatpush1.msra.mxu0 %v2895_v52  ;;  %1260 = vmatpush1.msra.mxu1 %v2898_v61 }
 0x351   :  { %1190 = vmatprep.subr.mxu0 %v2901_v20  ;;  %1261 = vmatprep.subr.mxu1 %v2904_v62 }
 0x352   :  { %1191 = vmatpush1.msra.mxu0 %v2907_v11  ;;  %1262 = vmatpush1.msra.mxu1 %v2910_v38 }
 0x353   :  { %1192 = vmatprep.subr.mxu0 %v2913_v47  ;;  %1263 = vmatprep.subr.mxu1 %v2916_v0 }
 0x354   :  { %1193 = vmatpush1.msra.mxu0 %v2919_v3  ;;  %1264 = vmatpush1.msra.mxu1 %v2922_v63 }
 0x355   :  { %1194 = vmatprep.subr.mxu0 %v2925_v55  ;;  %1265 = vmatprep.subr.mxu1 %v2928_v57 }
 0x356   :  { %1195 = vmatpush1.msra.mxu0 %v2931_v60  ;;  %1266 = vmatpush1.msra.mxu1 %v2934_v1 }
 0x357   :  { %1196 = vmatprep.subr.mxu0 %v2937_v54  ;;  %1267 = vmatprep.subr.mxu1 %v2940_v4 }
 0x358   :  { %1197 = vmatpush1.msra.mxu0 %v2431_v27  ;;  %1268 = vmatpush1.msra.mxu1 %v2433_v28  ;;  %v2987_v27 = vld [vmem:[#allocation8 + $0x1e8] sm:$0xff]  ;;  %v2990_v28 = vld [vmem:[#allocation8 + $0x1f8] sm:$0xff] }
 0x359   :  { %1198 = vmatprep.subr.mxu0 %v2439_v30  ;;  %1269 = vmatprep.subr.mxu1 %v2441_v31  ;;  %3535 = vst [vmem:[#allocation18_spill] sm:$0xff] %v2987_v27  ;;  %3536 = vst [vmem:[#allocation38_spill] sm:$0xff] %v2990_v28  ;;  %v3537_v31 = vld [vmem:[#allocation46_spill] sm:$0xff] }
 0x35a   :  { %1199 = vmatpush1.msra.mxu0 %v2445_v32  ;;  %1270 = vmatpush1.msra.mxu1 %v2447_v33 }
 0x35b   :  { %1200 = vmatprep.subr.mxu0 %v2449_v34  ;;  %1271 = vmatprep.subr.mxu1 %v2451_v35 }
 0x35c   :  { %1201 = vmatpush1.msra.mxu0 %v2457_v36  ;;  %1272 = vmatpush1.msra.mxu1 %v2459_v37  ;;  %v3538_v36 = vld [vmem:[#allocation48_spill] sm:$0xff] }
 0x35d   :  { %1202 = vmatprep.subr.mxu0 %v2465_v39  ;;  %1273 = vmatprep.subr.mxu1 %v2467_v40  ;;  %v3539_v39 = vld [vmem:[#allocation47_spill] sm:$0xff] }
 0x35e   :  { %1203 = vmatpush1.msra.mxu0 %v2471_v41  ;;  %1274 = vmatpush1.msra.mxu1 %v2473_v42 }
 0x35f   :  { %1204 = vmatprep.subr.mxu0 %v2475_v43  ;;  %1275 = vmatprep.subr.mxu1 %v2477_v44  ;;  %v3540_v43 = vld [vmem:[#allocation49_spill] sm:$0xff] }
 0x360   :  { %1205 = vmatpush1.msra.mxu0 %v2483_v45  ;;  %1276 = vmatpush1.msra.mxu1 %v2485_v46 }
 0x361   :  { %1206 = vmatprep.subr.mxu0 %v2491_v48  ;;  %1277 = vmatprep.subr.mxu1 %v2493_v49 }
 0x362   :  { %1207 = vmatpush1.msra.mxu0 %v2497_v50  ;;  %1278 = vmatpush1.msra.mxu1 %v2499_v51 }
 0x363   :  { %1208 = vmatprep.subr.mxu0 %v3482_v29  ;;  %1279 = vmatprep.subr.mxu1 %v3509_v5 }
 0x364   :  { %1209 = vmatpush1.msra.mxu0 %v3510_v6  ;;  %1280 = vmatpush1.msra.mxu1 %v3511_v7 }
 0x365   :  { %1210 = vmatprep.subr.mxu0 %v3512_v8  ;;  %1281 = vmatprep.subr.mxu1 %v3513_v9 }
 0x366   :  { %1211 = vmatpush1.msra.mxu0 %v3514_v10  ;;  %1282 = vmatpush1.msra.mxu1 %v3515_v12 }
 0x367   :  { %1212 = vmatprep.subr.mxu0 %v3516_v13  ;;  %1283 = vmatprep.subr.mxu1 %v3517_v14 }
 0x368   :  { %1213 = vmatpush1.msra.mxu0 %v3518_v15  ;;  %1284 = vmatpush1.msra.mxu1 %v3519_v16  ;;  %v3021_v15 = vld [vmem:[#allocation8 + $0x140] sm:$0xff]  ;;  %v3024_v16 = vld [vmem:[#allocation8 + $0x150] sm:$0xff] }
 0x369   :  { %1214 = vmatprep.subr.mxu0 %v3520_v17  ;;  %1285 = vmatprep.subr.mxu1 %v3521_v18  ;;  %v3027_v17 = vld [vmem:[#allocation8 + $0x128] sm:$0xff]  ;;  %v3030_v18 = vld [vmem:[#allocation8 + $0x138] sm:$0xff] }
 0x36a   :  { %1215 = vmatpush1.msra.mxu0 %v3522_v19  ;;  %1286 = vmatpush1.msra.mxu1 %v3523_v21  ;;  %v3033_v19 = vld [vmem:[#allocation8 + $0x120] sm:$0xff]  ;;  %v3036_v21 = vld [vmem:[#allocation8 + $0x130] sm:$0xff] }
 0x36b   :  { %1216 = vmatprep.subr.mxu0 %v3524_v22  ;;  %1287 = vmatprep.subr.mxu1 %v3525_v23  ;;  %v3039_v22 = vld [vmem:[#allocation8 + $0x108] sm:$0xff]  ;;  %v3042_v23 = vld [vmem:[#allocation8 + $0x118] sm:$0xff] }
 0x36c   :  { %1217 = vmatpush1.msra.mxu0 %v3526_v24  ;;  %1250 = vmatprep.mubr.f32.mxu0 %v3527_v25  ;;  %v3045_v24 = vld [vmem:[#allocation8 + $0x100] sm:$0xff] }
 0x36d   :  { %1288 = vmatpush1.msra.mxu1 %v3528_v26  ;;  %1321 = vmatprep.mubr.f32.mxu1 %v3527_v25  ;;  %v3048_v26 = vld [vmem:[#allocation8 + $0x110] sm:$0xff] }
 0x36e   :  { %1357 = vmatprep.subr.mxu0 %v2987_v27  ;;  %1428 = vmatprep.subr.mxu1 %v2990_v28 }
 0x40d   :  { %v1081_v30 = vpop.f32.mrf.mxu0  ;;  %v1152_v33 = vpop.f32.mrf.mxu1 }
 0x40e   :  { %v1157_v32 = vadd.f32 %v1081_v30, %v3537_v31  ;;  %v1159_v40 = vadd.f32 %v1152_v33, %v3539_v39  ;;  %v3054_v30 = vld [vmem:[#allocation8 + $0xf8] sm:$0xff]  ;;  %v3057_v31 = vld [vmem:[#allocation8 + $0xe0] sm:$0xff]  ;;  %v3063_v33 = vld [vmem:[#allocation8 + $0xc8] sm:$0xff] }
 0x40f   :  { %v1083_v34 = vpop.f32.mrf.mxu0  ;;  %v1154_v42 = vpop.f32.mrf.mxu1  ;;  %v3078_v39 = vld [vmem:[#allocation8 + $0xb8] sm:$0xff] }
 0x410   :  { %v1161_v35 = vmul.f32 0.5, %v1157_v32  ;;  %v1158_v37 = vadd.f32 %v1083_v34, %v3538_v36  ;;  %v1160_v44 = vadd.f32 %v1154_v42, %v3540_v43  ;;  %v3060_v32 = vld [vmem:[#allocation8 + $0xf0] sm:$0xff]  ;;  %v3066_v34 = vld [vmem:[#allocation8 + $0xd8] sm:$0xff]  ;;  %v3087_v42 = vld [vmem:[#allocation8 + $0x88] sm:$0xff] }
 0x411   :  { %v3072_v36 = vld [vmem:[#allocation8 + $0xd0] sm:$0xff]  ;;  %v3090_v43 = vld [vmem:[#allocation8 + $0x98] sm:$0xff] }
 0x412   :  { %2075 = vtanh.f32 %v1161_v35  ;;  %v1162_v41 = vmul.f32 0.5, %v1158_v37  ;;  %v1170_v45 = vmul.f32 0.5, %v1160_v44  ;;  %v3069_v35 = vld [vmem:[#allocation8 + $0xc0] sm:$0xff]  ;;  %v3075_v37 = vld [vmem:[#allocation8 + $0xa8] sm:$0xff]  ;;  %3541 = vst [vmem:[#allocation40_spill] sm:$0xff] %v3090_v43 }
 0x413   :  { %v3093_v44 = vld [vmem:[#allocation8 + $0x80] sm:$0xff] }
 0x414   :  { %2077 = vtanh.f32 %v1162_v41  ;;  %v3084_v41 = vld [vmem:[#allocation8 + $0xb0] sm:$0xff]  ;;  %3542 = vst [vmem:[#allocation39_spill] sm:$0xff] %v3093_v44 }
 0x415   :  { %2079 = vtanh.f32 %v1159_v40  ;;  %v3081_v40 = vld [vmem:[#allocation8 + $0xa0] sm:$0xff] }
 0x416   :  { %2081 = vtanh.f32 %v1170_v45  ;;  %v3096_v45 = vld [vmem:[#allocation8 + $0x90] sm:$0xff] }
 0x417   :  { %3543 = vst [vmem:[#allocation41_spill] sm:$0xff] %v3096_v45 }
 0x41f   :  { %v2076_v46 = vpop.eup %2075 }
 0x420   :  { %v1165_v48 = vmul.f32 0.5, %v2076_v46  ;;  %v3099_v46 = vld [vmem:[#allocation8 + $0x68] sm:$0xff] }
 0x421   :  { %v2078_v49 = vpop.eup %2077  ;;  %3544 = vst [vmem:[#allocation19_spill] sm:$0xff] %v3099_v46 }
 0x422   :  { %v1167_v50 = vadd.f32 0.5, %v1165_v48  ;;  %v1166_v51 = vmul.f32 0.5, %v2078_v49  ;;  %v2080_v29 = vpop.eup %2079  ;;  %v3102_v48 = vld [vmem:[#allocation8 + $0x78] sm:$0xff]  ;;  %v3105_v49 = vld [vmem:[#allocation8 + $0x60] sm:$0xff] }
 0x423   :  { %v2082_v9 = vpop.eup %2081  ;;  %3545 = vst [vmem:[#allocation20_spill] sm:$0xff] %v3102_v48  ;;  %3546 = vst [vmem:[#allocation21_spill] sm:$0xff] %v3105_v49 }
 0x424   :  { %v1168_v5 = vadd.f32 0.5, %v1166_v51  ;;  %v1175_v6 = vmul.f32 %v2080_v29, %v1167_v50  ;;  %v1172_v10 = vmul.f32 0.5, %v2082_v9  ;;  %v3108_v50 = vld [vmem:[#allocation8 + $0x70] sm:$0xff]  ;;  %v3111_v51 = vld [vmem:[#allocation8 + $0x48] sm:$0xff]  ;;  %v3114_v29 = vld [vmem:[#allocation8 + $0x58] sm:$0xff] }
 0x425   :  { %3547 = vst [vmem:[#allocation22_spill] sm:$0xff] %v3108_v50  ;;  %3548 = vst [vmem:[#allocation23_spill] sm:$0xff] %v3111_v51  ;;  %v3126_v9 = vld [vmem:[#allocation8 + $0x38] sm:$0xff] }
 0x426   :  { %v1174_v7 = vmul.f32 %v1168_v5, %v2880_v2  ;;  %v1173_v12 = vadd.f32 0.5, %v1172_v10  ;;  %v3051_v2 = vld [vmem:[#allocation8 + $0xe8] sm:$0xff]  ;;  %3549 = vst [vmem:[#allocation24_spill] sm:$0xff] %v3114_v29  ;;  %v3117_v5 = vld [vmem:[#allocation8 + $0x40] sm:$0xff]  ;;  %3553 = vst [vmem:[#allocation28_spill] sm:$0xff] %v3126_v9 }
 0x427   :  { %3550 = vst [vmem:[#allocation25_spill] sm:$0xff] %v3117_v5  ;;  %v3129_v10 = vld [vmem:[#allocation8 + $0x20] sm:$0xff] }
 0x428   :  { %v2998_v8 = vadd.f32 %v1175_v6, %v1174_v7  ;;  %v3120_v6 = vld [vmem:[#allocation8 + $0x50] sm:$0xff]  ;;  %v3123_v7 = vld [vmem:[#allocation8 + $0x28] sm:$0xff]  ;;  %3554 = vst [vmem:[#allocation29_spill] sm:$0xff] %v3129_v10 }
 0x429   :  { %3551 = vst [vmem:[#allocation26_spill] sm:$0xff] %v3120_v6  ;;  %3552 = vst [vmem:[#allocation27_spill] sm:$0xff] %v3123_v7 }
 0x42a   :  { %2083 = vtanh.f32 %v2998_v8 }
 0x437   :  { %v2084_v13 = vpop.eup %2083 }
 0x438   :  { %v1178_v14 = vmul.f32 %v2084_v13, %v1173_v12  ;;  %v3132_v12 = vld [vmem:[#allocation8 + $0x30] sm:$0xff]  ;;  %v3135_v13 = vld [vmem:[#allocation8 + $0x8] sm:$0xff] }
 0x439   :  { %3555 = vst [vmem:[#allocation30_spill] sm:$0xff] %v3132_v12  ;;  %3556 = vst [vmem:[#allocation31_spill] sm:$0xff] %v3135_v13 }
 0x43a   :  { %1251 = vmatmul.mubr.f32.vlgmr.msra.gmra.mxu0 %v1178_v14  ;;  %1322 = vmatmul.mubr.f32.vlgmr.msra.gmra.mxu1 %v1178_v14  ;;  %v3138_v14 = vld [vmem:[#allocation8 + $0x18] sm:$0xff] }
 0x43b   :  { %1358 = vmatpush1.msra.mxu0 %v2883_v59  ;;  %1429 = vmatpush1.msra.mxu1 %v2886_v56  ;;  %3557 = vst [vmem:[#allocation32_spill] sm:$0xff] %v3138_v14 }
 0x43c   :  { %1359 = vmatprep.subr.mxu0 %v2889_v53  ;;  %1430 = vmatprep.subr.mxu1 %v2892_v58 }
 0x43d   :  { %1360 = vmatpush1.msra.mxu0 %v2895_v52  ;;  %1431 = vmatpush1.msra.mxu1 %v2898_v61 }
 0x43e   :  { %1361 = vmatprep.subr.mxu0 %v2901_v20  ;;  %1432 = vmatprep.subr.mxu1 %v2904_v62 }
 0x43f   :  { %1362 = vmatpush1.msra.mxu0 %v2907_v11  ;;  %1433 = vmatpush1.msra.mxu1 %v2910_v38 }
 0x440   :  { %1363 = vmatprep.subr.mxu0 %v2913_v47  ;;  %1434 = vmatprep.subr.mxu1 %v2916_v0 }
 0x441   :  { %1364 = vmatpush1.msra.mxu0 %v2919_v3  ;;  %1435 = vmatpush1.msra.mxu1 %v2922_v63 }
 0x442   :  { %1365 = vmatprep.subr.mxu0 %v2925_v55  ;;  %1436 = vmatprep.subr.mxu1 %v2928_v57 }
 0x443   :  { %1366 = vmatpush1.msra.mxu0 %v2931_v60  ;;  %1437 = vmatpush1.msra.mxu1 %v2934_v1 }
 0x444   :  { %1367 = vmatprep.subr.mxu0 %v2937_v54  ;;  %1438 = vmatprep.subr.mxu1 %v2940_v4 }
 0x445   :  { %1368 = vmatpush1.msra.mxu0 %v3021_v15  ;;  %1439 = vmatpush1.msra.mxu1 %v3024_v16 }
 0x446   :  { %1369 = vmatprep.subr.mxu0 %v3027_v17  ;;  %1440 = vmatprep.subr.mxu1 %v3030_v18 }
 0x447   :  { %1370 = vmatpush1.msra.mxu0 %v3033_v19  ;;  %1441 = vmatpush1.msra.mxu1 %v3036_v21 }
 0x448   :  { %1371 = vmatprep.subr.mxu0 %v3039_v22  ;;  %1442 = vmatprep.subr.mxu1 %v3042_v23 }
 0x449   :  { %1372 = vmatpush1.msra.mxu0 %v3045_v24  ;;  %1443 = vmatpush1.msra.mxu1 %v3048_v26 }
 0x44a   :  { %1373 = vmatprep.subr.mxu0 %v3051_v2  ;;  %1444 = vmatprep.subr.mxu1 %v3054_v30 }
 0x44b   :  { %1374 = vmatpush1.msra.mxu0 %v3057_v31  ;;  %1445 = vmatpush1.msra.mxu1 %v3060_v32 }
 0x44c   :  { %1375 = vmatprep.subr.mxu0 %v3063_v33  ;;  %1446 = vmatprep.subr.mxu1 %v3066_v34 }
 0x44d   :  { %1376 = vmatpush1.msra.mxu0 %v3069_v35  ;;  %1447 = vmatpush1.msra.mxu1 %v3072_v36 }
 0x44e   :  { %1377 = vmatprep.subr.mxu0 %v3075_v37  ;;  %1448 = vmatprep.subr.mxu1 %v3078_v39 }
 0x44f   :  { %1378 = vmatpush1.msra.mxu0 %v3081_v40  ;;  %1449 = vmatpush1.msra.mxu1 %v3084_v41 }
 0x450   :  { %1379 = vmatprep.subr.mxu0 %v3087_v42  ;;  %1450 = vmatprep.subr.mxu1 %v3090_v43 }
 0x451   :  { %1380 = vmatpush1.msra.mxu0 %v3093_v44  ;;  %1451 = vmatpush1.msra.mxu1 %v3096_v45 }
 0x452   :  { %1381 = vmatprep.subr.mxu0 %v3099_v46  ;;  %1452 = vmatprep.subr.mxu1 %v3102_v48 }
 0x453   :  { %1382 = vmatpush1.msra.mxu0 %v3105_v49  ;;  %1453 = vmatpush1.msra.mxu1 %v3108_v50 }
 0x454   :  { %1383 = vmatprep.subr.mxu0 %v3111_v51  ;;  %1454 = vmatprep.subr.mxu1 %v3114_v29  ;;  %v3561_v29 = vld [vmem:[#allocation52_spill] sm:$0xff]  ;;  %v3562_v51 = vld [vmem:[#allocation51_spill] sm:$0xff] }
 0x455   :  { %1384 = vmatpush1.msra.mxu0 %v3117_v5  ;;  %1455 = vmatpush1.msra.mxu1 %v3120_v6 }
 0x456   :  { %1385 = vmatprep.subr.mxu0 %v3123_v7  ;;  %1456 = vmatprep.subr.mxu1 %v3126_v9  ;;  %v3141_v7 = vld [vmem:[#allocation8] sm:$0xff]  ;;  %v3145_v9 = vld [vmem:[#allocation8 + $0x10] sm:$0xff] }
 0x457   :  { %1386 = vmatpush1.msra.mxu0 %v3129_v10  ;;  %1457 = vmatpush1.msra.mxu1 %v3132_v12  ;;  %3558 = vst [vmem:[#allocation33_spill] sm:$0xff] %v3141_v7  ;;  %3559 = vst [vmem:[#allocation34_spill] sm:$0xff] %v3145_v9  ;;  %v3560_v12 = vld [vmem:[#allocation50_spill] sm:$0xff] }
 0x458   :  { %1387 = vmatprep.subr.mxu0 %v3135_v13  ;;  %1458 = vmatprep.subr.mxu1 %v3138_v14 }
 0x459   :  { %1388 = vmatpush1.msra.mxu0 %v3141_v7  ;;  %1421 = vmatprep.mubr.f32.mxu0 %v3527_v25 }
 0x45a   :  { %1459 = vmatpush1.msra.mxu1 %v3145_v9  ;;  %1492 = vmatprep.mubr.f32.mxu1 %v3527_v25  ;;  %v3563_v25 = vld [vmem:[#allocation53_spill] sm:$0xff] }
 0x45b   :  { %1528 = vmatprep.subr.mxu0 %v2987_v27  ;;  %1599 = vmatprep.subr.mxu1 %v2990_v28 }
 0x4fa   :  { %v1252_v13 = vpop.f32.mrf.mxu0  ;;  %v1323_v14 = vpop.f32.mrf.mxu1 }
 0x4fb   :  { %v1328_v10 = vadd.f32 %v1252_v13, %v3560_v12  ;;  %v1330_v50 = vadd.f32 %v1323_v14, %v3562_v51  ;;  %v3574_v14 = vld [vmem:[#allocation26_spill] sm:$0xff] }
 0x4fc   :  { %v1254_v6 = vpop.f32.mrf.mxu0  ;;  %v1325_v9 = vpop.f32.mrf.mxu1 }
 0x4fd   :  { %v1332_v5 = vmul.f32 0.5, %v1328_v10  ;;  %v1329_v7 = vadd.f32 %v1254_v6, %v3561_v29  ;;  %v1331_v48 = vadd.f32 %v1325_v9, %v3563_v25  ;;  %v3571_v6 = vld [vmem:[#allocation23_spill] sm:$0xff]  ;;  %v3573_v9 = vld [vmem:[#allocation25_spill] sm:$0xff] }
 0x4ff   :  { %2085 = vtanh.f32 %v1332_v5  ;;  %v1333_v49 = vmul.f32 0.5, %v1329_v7  ;;  %v1341_v27 = vmul.f32 0.5, %v1331_v48  ;;  %v3572_v7 = vld [vmem:[#allocation24_spill] sm:$0xff] }
 0x501   :  { %2087 = vtanh.f32 %v1333_v49 }
 0x502   :  { %2089 = vtanh.f32 %v1330_v50 }
 0x503   :  { %2091 = vtanh.f32 %v1341_v27  ;;  %v3564_v27 = vld [vmem:[#allocation40_spill] sm:$0xff] }
 0x50c   :  { %v2086_v46 = vpop.eup %2085 }
 0x50d   :  { %v1336_v28 = vmul.f32 0.5, %v2086_v46  ;;  %v3570_v46 = vld [vmem:[#allocation22_spill] sm:$0xff] }
 0x50e   :  { %v2088_v45 = vpop.eup %2087 }
 0x50f   :  { %v1338_v44 = vadd.f32 0.5, %v1336_v28  ;;  %v1337_v12 = vmul.f32 0.5, %v2088_v45  ;;  %v2090_v13 = vpop.eup %2089  ;;  %v3565_v28 = vld [vmem:[#allocation39_spill] sm:$0xff]  ;;  %v3569_v45 = vld [vmem:[#allocation21_spill] sm:$0xff] }
 0x510   :  { %v2092_v49 = vpop.eup %2091 }
 0x511   :  { %v1339_v10 = vadd.f32 0.5, %v1337_v12  ;;  %v1346_v43 = vmul.f32 %v2090_v13, %v1338_v44  ;;  %v1343_v50 = vmul.f32 0.5, %v2092_v49  ;;  %v3568_v44 = vld [vmem:[#allocation20_spill] sm:$0xff]  ;;  %v3575_v12 = vld [vmem:[#allocation27_spill] sm:$0xff] }
 0x512   :  { %v3576_v13 = vld [vmem:[#allocation28_spill] sm:$0xff]  ;;  %v3579_v49 = vld [vmem:[#allocation31_spill] sm:$0xff] }
 0x513   :  { %v1345_v29 = vmul.f32 %v1339_v10, %v2998_v8  ;;  %v1344_v51 = vadd.f32 0.5, %v1343_v50  ;;  %v3566_v8 = vld [vmem:[#allocation41_spill] sm:$0xff]  ;;  %v3580_v50 = vld [vmem:[#allocation32_spill] sm:$0xff] }
 0x514   :  { %v3577_v10 = vld [vmem:[#allocation29_spill] sm:$0xff] }
 0x515   :  { %v3156_v5 = vadd.f32 %v1346_v43, %v1345_v29  ;;  %v3567_v43 = vld [vmem:[#allocation19_spill] sm:$0xff]  ;;  %v3578_v29 = vld [vmem:[#allocation30_spill] sm:$0xff] }
 0x517   :  { %2093 = vtanh.f32 %v3156_v5 }
 0x524   :  { %v2094_v25 = vpop.eup %2093 }
 0x525   :  { %v1349_v48 = vmul.f32 %v2094_v25, %v1344_v51  ;;  %v3581_v51 = vld [vmem:[#allocation33_spill] sm:$0xff]  ;;  %v3582_v25 = vmov 0.0  }
 0x527   :  { %1422 = vmatmul.mubr.f32.vlgmr.msra.gmra.mxu0 %v1349_v48  ;;  %1493 = vmatmul.mubr.f32.vlgmr.msra.gmra.mxu1 %v1349_v48  ;;  %v3583_v48 = vld [vmem:[#allocation34_spill] sm:$0xff] }
 0x528   :  { %1529 = vmatpush1.msra.mxu0 %v2883_v59  ;;  %1600 = vmatpush1.msra.mxu1 %v2886_v56 }
 0x529   :  { %1530 = vmatprep.subr.mxu0 %v2889_v53  ;;  %1601 = vmatprep.subr.mxu1 %v2892_v58 }
 0x52a   :  { %1531 = vmatpush1.msra.mxu0 %v2895_v52  ;;  %1602 = vmatpush1.msra.mxu1 %v2898_v61 }
 0x52b   :  { %1532 = vmatprep.subr.mxu0 %v2901_v20  ;;  %1603 = vmatprep.subr.mxu1 %v2904_v62 }
 0x52c   :  { %1533 = vmatpush1.msra.mxu0 %v2907_v11  ;;  %1604 = vmatpush1.msra.mxu1 %v2910_v38 }
 0x52d   :  { %1534 = vmatprep.subr.mxu0 %v2913_v47  ;;  %1605 = vmatprep.subr.mxu1 %v2916_v0 }
 0x52e   :  { %1535 = vmatpush1.msra.mxu0 %v2919_v3  ;;  %1606 = vmatpush1.msra.mxu1 %v2922_v63 }
 0x52f   :  { %1536 = vmatprep.subr.mxu0 %v2925_v55  ;;  %1607 = vmatprep.subr.mxu1 %v2928_v57 }
 0x530   :  { %1537 = vmatpush1.msra.mxu0 %v2931_v60  ;;  %1608 = vmatpush1.msra.mxu1 %v2934_v1 }
 0x531   :  { %1538 = vmatprep.subr.mxu0 %v2937_v54  ;;  %1609 = vmatprep.subr.mxu1 %v2940_v4 }
 0x532   :  { %1539 = vmatpush1.msra.mxu0 %v3021_v15  ;;  %1610 = vmatpush1.msra.mxu1 %v3024_v16 }
 0x533   :  { %1540 = vmatprep.subr.mxu0 %v3027_v17  ;;  %1611 = vmatprep.subr.mxu1 %v3030_v18 }
 0x534   :  { %1541 = vmatpush1.msra.mxu0 %v3033_v19  ;;  %1612 = vmatpush1.msra.mxu1 %v3036_v21 }
 0x535   :  { %1542 = vmatprep.subr.mxu0 %v3039_v22  ;;  %1613 = vmatprep.subr.mxu1 %v3042_v23 }
 0x536   :  { %1543 = vmatpush1.msra.mxu0 %v3045_v24  ;;  %1614 = vmatpush1.msra.mxu1 %v3048_v26 }
 0x537   :  { %1544 = vmatprep.subr.mxu0 %v3051_v2  ;;  %1615 = vmatprep.subr.mxu1 %v3054_v30 }
 0x538   :  { %1545 = vmatpush1.msra.mxu0 %v3057_v31  ;;  %1616 = vmatpush1.msra.mxu1 %v3060_v32 }
 0x539   :  { %1546 = vmatprep.subr.mxu0 %v3063_v33  ;;  %1617 = vmatprep.subr.mxu1 %v3066_v34 }
 0x53a   :  { %1547 = vmatpush1.msra.mxu0 %v3069_v35  ;;  %1618 = vmatpush1.msra.mxu1 %v3072_v36 }
 0x53b   :  { %1548 = vmatprep.subr.mxu0 %v3075_v37  ;;  %1619 = vmatprep.subr.mxu1 %v3078_v39 }
 0x53c   :  { %1549 = vmatpush1.msra.mxu0 %v3081_v40  ;;  %1620 = vmatpush1.msra.mxu1 %v3084_v41 }
 0x53d   :  { %1550 = vmatprep.subr.mxu0 %v3087_v42  ;;  %1621 = vmatprep.subr.mxu1 %v3564_v27 }
 0x53e   :  { %1551 = vmatpush1.msra.mxu0 %v3565_v28  ;;  %1622 = vmatpush1.msra.mxu1 %v3566_v8 }
 0x53f   :  { %1552 = vmatprep.subr.mxu0 %v3567_v43  ;;  %1623 = vmatprep.subr.mxu1 %v3568_v44 }
 0x540   :  { %1553 = vmatpush1.msra.mxu0 %v3569_v45  ;;  %1624 = vmatpush1.msra.mxu1 %v3570_v46 }
 0x541   :  { %1554 = vmatprep.subr.mxu0 %v3571_v6  ;;  %1625 = vmatprep.subr.mxu1 %v3572_v7  ;;  %v3587_v6 = vld [vmem:[#allocation56_spill] sm:$0xff] }
 0x542   :  { %1555 = vmatpush1.msra.mxu0 %v3573_v9  ;;  %1626 = vmatpush1.msra.mxu1 %v3574_v14  ;;  %v3584_v14 = vld [vmem:[#allocation18_spill] sm:$0xff] }
 0x543   :  { %1556 = vmatprep.subr.mxu0 %v3575_v12  ;;  %1627 = vmatprep.subr.mxu1 %v3576_v13  ;;  %v3585_v12 = vld [vmem:[#allocation38_spill] sm:$0xff] }
 0x544   :  { %1557 = vmatpush1.msra.mxu0 %v3577_v10  ;;  %1628 = vmatpush1.msra.mxu1 %v3578_v29  ;;  %v3586_v10 = vld [vmem:[#allocation54_spill] sm:$0xff] }
 0x545   :  { %1558 = vmatprep.subr.mxu0 %v3579_v49  ;;  %1629 = vmatprep.subr.mxu1 %v3580_v50 }
 0x546   :  { %1559 = vmatpush1.msra.mxu0 %v3581_v51  ;;  %1592 = vmatprep.mubr.f32.mxu0 %v3582_v25  ;;  %v3588_v51 = vld [vmem:[#allocation55_spill] sm:$0xff] }
 0x547   :  { %1630 = vmatpush1.msra.mxu1 %v3583_v48  ;;  %1663 = vmatprep.mubr.f32.mxu1 %v3582_v25  ;;  %v3589_v25 = vld [vmem:[#allocation57_spill] sm:$0xff] }
 0x548   :  { %1699 = vmatprep.subr.mxu0 %v3584_v14  ;;  %1770 = vmatprep.subr.mxu1 %v3585_v12 }
 0x5e7   :  { %v1423_v13 = vpop.f32.mrf.mxu0  ;;  %v1494_v29 = vpop.f32.mrf.mxu1 }
 0x5e8   :  { %v1499_v9 = vadd.f32 %v1423_v13, %v3586_v10  ;;  %v1501_v46 = vadd.f32 %v1494_v29, %v3588_v51 }
 0x5e9   :  { %v1425_v7 = vpop.f32.mrf.mxu0  ;;  %v1496_v48 = vpop.f32.mrf.mxu1 }
 0x5ea   :  { %v1503_v49 = vmul.f32 0.5, %v1499_v9  ;;  %v1500_v50 = vadd.f32 %v1425_v7, %v3587_v6  ;;  %v1502_v44 = vadd.f32 %v1496_v48, %v3589_v25  ;;  %v1878_v25 = vld [vmem:[#allocation9 + $0x78] sm:$0xff]  ;;  %v1877_v48 = vld [vmem:[#allocation9 + $0x70] sm:$0xff] }
 0x5ec   :  { %2095 = vtanh.f32 %v1503_v49  ;;  %v1504_v45 = vmul.f32 0.5, %v1500_v50  ;;  %v1512_v14 = vmul.f32 0.5, %v1502_v44 }
 0x5ee   :  { %2097 = vtanh.f32 %v1504_v45 }
 0x5ef   :  { %2099 = vtanh.f32 %v1501_v46 }
 0x5f0   :  { %2101 = vtanh.f32 %v1512_v14  ;;  %v1876_v14 = vld [vmem:[#allocation9 + $0x68] sm:$0xff] }
 0x5f9   :  { %v2096_v43 = vpop.eup %2095 }
 0x5fa   :  { %v1507_v12 = vmul.f32 0.5, %v2096_v43 }
 0x5fb   :  { %v2098_v8 = vpop.eup %2097 }
 0x5fc   :  { %v1509_v28 = vadd.f32 0.5, %v1507_v12  ;;  %v1508_v13 = vmul.f32 0.5, %v2098_v8  ;;  %v2100_v10 = vpop.eup %2099  ;;  %v1875_v12 = vld [vmem:[#allocation9 + $0x60] sm:$0xff] }
 0x5fd   :  { %v2102_v45 = vpop.eup %2101 }
 0x5fe   :  { %v1510_v9 = vadd.f32 0.5, %v1508_v13  ;;  %v1517_v27 = vmul.f32 %v2100_v10, %v1509_v28  ;;  %v1514_v46 = vmul.f32 0.5, %v2102_v45  ;;  %v1874_v13 = vld [vmem:[#allocation9 + $0x58] sm:$0xff]  ;;  %v1873_v10 = vld [vmem:[#allocation9 + $0x50] sm:$0xff] }
 0x5ff   :  { %v1869_v45 = vld [vmem:[#allocation9 + $0x30] sm:$0xff] }
 0x600   :  { %v1516_v6 = vmul.f32 %v1510_v9, %v3156_v5  ;;  %v1515_v29 = vadd.f32 0.5, %v1514_v46  ;;  %v1872_v9 = vld [vmem:[#allocation9 + $0x48] sm:$0xff] }
 0x601   :  { %v1868_v46 = vld [vmem:[#allocation9 + $0x28] sm:$0xff] }
 0x602   :  { %v3230_v7 = vadd.f32 %v1517_v27, %v1516_v6  ;;  %v1871_v6 = vld [vmem:[#allocation9 + $0x40] sm:$0xff] }
 0x604   :  { %2103 = vtanh.f32 %v3230_v7 }
 0x611   :  { %v2104_v49 = vpop.eup %2103 }
 0x612   :  { %v1520_v44 = vmul.f32 %v2104_v49, %v1515_v29  ;;  %v1867_v29 = vld [vmem:[#allocation9 + $0x20] sm:$0xff]  ;;  %v1866_v49 = vld [vmem:[#allocation9 + $0x18] sm:$0xff] }
 0x614   :  { %1593 = vmatmul.mubr.f32.vlgmr.msra.gmra.mxu0 %v1520_v44  ;;  %1664 = vmatmul.mubr.f32.vlgmr.msra.gmra.mxu1 %v1520_v44  ;;  %v1865_v44 = vld [vmem:[#allocation9 + $0x10] sm:$0xff] }
 0x615   :  { %1700 = vmatpush1.msra.mxu0 %v2883_v59  ;;  %1771 = vmatpush1.msra.mxu1 %v2886_v56  ;;  %v3590_v59 = vld [vmem:[#allocation40_spill] sm:$0xff]  ;;  %v3591_v56 = vld [vmem:[#allocation39_spill] sm:$0xff] }
 0x616   :  { %1701 = vmatprep.subr.mxu0 %v2889_v53  ;;  %1772 = vmatprep.subr.mxu1 %v2892_v58  ;;  %v3592_v53 = vld [vmem:[#allocation41_spill] sm:$0xff]  ;;  %v3593_v58 = vld [vmem:[#allocation19_spill] sm:$0xff] }
 0x617   :  { %1702 = vmatpush1.msra.mxu0 %v2895_v52  ;;  %1773 = vmatpush1.msra.mxu1 %v2898_v61  ;;  %v3594_v52 = vld [vmem:[#allocation20_spill] sm:$0xff]  ;;  %v3595_v61 = vld [vmem:[#allocation21_spill] sm:$0xff] }
 0x618   :  { %1703 = vmatprep.subr.mxu0 %v2901_v20  ;;  %1774 = vmatprep.subr.mxu1 %v2904_v62  ;;  %v3596_v20 = vld [vmem:[#allocation22_spill] sm:$0xff]  ;;  %v3597_v62 = vld [vmem:[#allocation23_spill] sm:$0xff] }
 0x619   :  { %1704 = vmatpush1.msra.mxu0 %v2907_v11  ;;  %1775 = vmatpush1.msra.mxu1 %v2910_v38  ;;  %v3598_v11 = vld [vmem:[#allocation24_spill] sm:$0xff]  ;;  %v3599_v38 = vld [vmem:[#allocation25_spill] sm:$0xff] }
 0x61a   :  { %1705 = vmatprep.subr.mxu0 %v2913_v47  ;;  %1776 = vmatprep.subr.mxu1 %v2916_v0  ;;  %v3600_v47 = vld [vmem:[#allocation26_spill] sm:$0xff]  ;;  %v3601_v0 = vld [vmem:[#allocation27_spill] sm:$0xff] }
 0x61b   :  { %1706 = vmatpush1.msra.mxu0 %v2919_v3  ;;  %1777 = vmatpush1.msra.mxu1 %v2922_v63  ;;  %v3602_v3 = vld [vmem:[#allocation28_spill] sm:$0xff]  ;;  %v3603_v63 = vld [vmem:[#allocation29_spill] sm:$0xff] }
 0x61c   :  { %1707 = vmatprep.subr.mxu0 %v2925_v55  ;;  %1778 = vmatprep.subr.mxu1 %v2928_v57  ;;  %v3604_v55 = vld [vmem:[#allocation30_spill] sm:$0xff]  ;;  %v3605_v57 = vld [vmem:[#allocation31_spill] sm:$0xff] }
 0x61d   :  { %1708 = vmatpush1.msra.mxu0 %v2931_v60  ;;  %1779 = vmatpush1.msra.mxu1 %v2934_v1  ;;  %v3606_v60 = vld [vmem:[#allocation32_spill] sm:$0xff]  ;;  %v3607_v1 = vld [vmem:[#allocation33_spill] sm:$0xff] }
 0x61e   :  { %1709 = vmatprep.subr.mxu0 %v2937_v54  ;;  %1780 = vmatprep.subr.mxu1 %v2940_v4  ;;  %v3608_v54 = vmov 0.0   ;;  %v3609_v4 = vld [vmem:[#allocation34_spill] sm:$0xff] }
 0x61f   :  { %1710 = vmatpush1.msra.mxu0 %v3021_v15  ;;  %1781 = vmatpush1.msra.mxu1 %v3024_v16  ;;  %v3610_v16 = vld [vmem:[#allocation58_spill] sm:$0xff] }
 0x620   :  { %1711 = vmatprep.subr.mxu0 %v3027_v17  ;;  %1782 = vmatprep.subr.mxu1 %v3030_v18 }
 0x621   :  { %1712 = vmatpush1.msra.mxu0 %v3033_v19  ;;  %1783 = vmatpush1.msra.mxu1 %v3036_v21 }
 0x622   :  { %1713 = vmatprep.subr.mxu0 %v3039_v22  ;;  %1784 = vmatprep.subr.mxu1 %v3042_v23  ;;  %v3611_v22 = vld [vmem:[#allocation60_spill] sm:$0xff] }
 0x623   :  { %1714 = vmatpush1.msra.mxu0 %v3045_v24  ;;  %1785 = vmatpush1.msra.mxu1 %v3048_v26  ;;  %v3612_v24 = vld [vmem:[#allocation59_spill] sm:$0xff] }
 0x624   :  { %1715 = vmatprep.subr.mxu0 %v3051_v2  ;;  %1786 = vmatprep.subr.mxu1 %v3054_v30 }
 0x625   :  { %1716 = vmatpush1.msra.mxu0 %v3057_v31  ;;  %1787 = vmatpush1.msra.mxu1 %v3060_v32  ;;  %v3613_v31 = vld [vmem:[#allocation61_spill] sm:$0xff] }
 0x626   :  { %1717 = vmatprep.subr.mxu0 %v3063_v33  ;;  %1788 = vmatprep.subr.mxu1 %v3066_v34 }
 0x627   :  { %1718 = vmatpush1.msra.mxu0 %v3069_v35  ;;  %1789 = vmatpush1.msra.mxu1 %v3072_v36 }
 0x628   :  { %1719 = vmatprep.subr.mxu0 %v3075_v37  ;;  %1790 = vmatprep.subr.mxu1 %v3078_v39 }
 0x629   :  { %1720 = vmatpush1.msra.mxu0 %v3081_v40  ;;  %1791 = vmatpush1.msra.mxu1 %v3084_v41 }
 0x62a   :  { %1721 = vmatprep.subr.mxu0 %v3087_v42  ;;  %1792 = vmatprep.subr.mxu1 %v3590_v59  ;;  %v1864_v59 = vld [vmem:[#allocation9 + $0x8] sm:$0xff] }
 0x62b   :  { %1722 = vmatpush1.msra.mxu0 %v3591_v56  ;;  %1793 = vmatpush1.msra.mxu1 %v3592_v53  ;;  %v1863_v56 = vld [vmem:[#allocation9] sm:$0xff] }
 0x62c   :  { %1723 = vmatprep.subr.mxu0 %v3593_v58  ;;  %1794 = vmatprep.subr.mxu1 %v3594_v52  ;;  %v3614_v58 = vld [vmem:[#allocation62_spill] sm:$0xff] }
 0x62d   :  { %1724 = vmatpush1.msra.mxu0 %v3595_v61  ;;  %1795 = vmatpush1.msra.mxu1 %v3596_v20 }
 0x62e   :  { %1725 = vmatprep.subr.mxu0 %v3597_v62  ;;  %1796 = vmatprep.subr.mxu1 %v3598_v11  ;;  %v3615_v11 = vld [vmem:[#allocation64_spill] sm:$0xff] }
 0x62f   :  { %1726 = vmatpush1.msra.mxu0 %v3599_v38  ;;  %1797 = vmatpush1.msra.mxu1 %v3600_v47  ;;  %v3616_v47 = vld [vmem:[#allocation63_spill] sm:$0xff] }
 0x630   :  { %1727 = vmatprep.subr.mxu0 %v3601_v0  ;;  %1798 = vmatprep.subr.mxu1 %v3602_v3 }
 0x631   :  { %1728 = vmatpush1.msra.mxu0 %v3603_v63  ;;  %1799 = vmatpush1.msra.mxu1 %v3604_v55  ;;  %v3617_v55 = vld [vmem:[#allocation65_spill] sm:$0xff] }
 0x632   :  { %1729 = vmatprep.subr.mxu0 %v3605_v57  ;;  %1800 = vmatprep.subr.mxu1 %v3606_v60 }
 0x633   :  { %1730 = vmatpush1.msra.mxu0 %v3607_v1  ;;  %1763 = vmatprep.mubr.f32.mxu0 %v3608_v54 }
 0x634   :  { %1801 = vmatpush1.msra.mxu1 %v3609_v4  ;;  %1834 = vmatprep.mubr.f32.mxu1 %v3608_v54 }
 0x635   :  { %1999 = vmatprep.subr.mxu0 %v3608_v54 }
 0x6d4   :  { %v1594_v15 = vpop.f32.mrf.mxu0  ;;  %v1665_v18 = vpop.f32.mrf.mxu1 }
 0x6d5   :  { %v1670_v17 = vadd.f32 %v1594_v15, %v3610_v16  ;;  %v1672_v26 = vadd.f32 %v1665_v18, %v3612_v24 }
 0x6d6   :  { %v1596_v19 = vpop.f32.mrf.mxu0  ;;  %v1667_v30 = vpop.f32.mrf.mxu1 }
 0x6d7   :  { %v1674_v21 = vmul.f32 0.5, %v1670_v17  ;;  %v1671_v23 = vadd.f32 %v1596_v19, %v3611_v22  ;;  %v1673_v32 = vadd.f32 %v1667_v30, %v3613_v31  ;;  %v1981_v31 = vld [vmem:[%s3338_s5] ss:$0 sm:$0xff] }
 0x6d9   :  { %2105 = vtanh.f32 %v1674_v21  ;;  %v1675_v2 = vmul.f32 0.5, %v1671_v23  ;;  %v1683_v33 = vmul.f32 0.5, %v1673_v32 }
 0x6db   :  { %2107 = vtanh.f32 %v1675_v2 }
 0x6dc   :  { %2109 = vtanh.f32 %v1672_v26 }
 0x6dd   :  { %2111 = vtanh.f32 %v1683_v33 }
 0x6e6   :  { %v2106_v34 = vpop.eup %2105 }
 0x6e7   :  { %v1678_v35 = vmul.f32 0.5, %v2106_v34 }
 0x6e8   :  { %v2108_v36 = vpop.eup %2107 }
 0x6e9   :  { %v1680_v37 = vadd.f32 0.5, %v1678_v35  ;;  %v1679_v39 = vmul.f32 0.5, %v2108_v36  ;;  %v2110_v40 = vpop.eup %2109 }
 0x6ea   :  { %v2112_v28 = vpop.eup %2111 }
 0x6eb   :  { %v1681_v41 = vadd.f32 0.5, %v1679_v39  ;;  %v1688_v42 = vmul.f32 %v2110_v40, %v1680_v37  ;;  %v1685_v8 = vmul.f32 0.5, %v2112_v28 }
 0x6ed   :  { %v1687_v5 = vmul.f32 %v1681_v41, %v3230_v7  ;;  %v1686_v43 = vadd.f32 0.5, %v1685_v8  ;;  %v1870_v7 = vld [vmem:[#allocation9 + $0x38] sm:$0xff] }
 0x6ef   :  { %v3303_v27 = vadd.f32 %v1688_v42, %v1687_v5 }
 0x6f1   :  { %2113 = vtanh.f32 %v3303_v27 }
 0x6fe   :  { %v2114_v50 = vpop.eup %2113 }
 0x6ff   :  { %v1691_v51 = vmul.f32 %v2114_v50, %v1686_v43 }
 0x701   :  { %1764 = vmatmul.mubr.f32.vlgmr.msra.gmra.mxu0 %v1691_v51  ;;  %1835 = vmatmul.mubr.f32.vlgmr.msra.gmra.mxu1 %v1691_v51 }
 0x702   :  { %2000 = vmatpush3.msra.mxu0 %v1878_v25  ;;  %2031 = vmatprep.mubr.msk.f32.mxu0 %vm2306_vm0, %v3608_v54 }
 0x703   :  { %2001 = vmatprep.subr.mxu0 %v3608_v54 }
 0x704   :  { %2002 = vmatpush3.msra.mxu0 %v1877_v48 }
 0x705   :  { %2003 = vmatprep.subr.mxu0 %v3608_v54 }
 0x706   :  { %2004 = vmatpush3.msra.mxu0 %v1876_v14 }
 0x707   :  { %2005 = vmatprep.subr.mxu0 %v3608_v54 }
 0x708   :  { %2006 = vmatpush3.msra.mxu0 %v1875_v12 }
 0x709   :  { %2007 = vmatprep.subr.mxu0 %v3608_v54 }
 0x70a   :  { %2008 = vmatpush3.msra.mxu0 %v1874_v13 }
 0x70b   :  { %2009 = vmatprep.subr.mxu0 %v3608_v54 }
 0x70c   :  { %2010 = vmatpush3.msra.mxu0 %v1873_v10 }
 0x70d   :  { %2011 = vmatprep.subr.mxu0 %v3608_v54 }
 0x70e   :  { %2012 = vmatpush3.msra.mxu0 %v1872_v9 }
 0x70f   :  { %2013 = vmatprep.subr.mxu0 %v3608_v54 }
 0x710   :  { %2014 = vmatpush3.msra.mxu0 %v1871_v6 }
 0x711   :  { %2015 = vmatprep.subr.mxu0 %v3608_v54 }
 0x712   :  { %2016 = vmatpush3.msra.mxu0 %v1870_v7 }
 0x713   :  { %2017 = vmatprep.subr.mxu0 %v3608_v54 }
 0x714   :  { %2018 = vmatpush3.msra.mxu0 %v1869_v45 }
 0x715   :  { %2019 = vmatprep.subr.mxu0 %v3608_v54 }
 0x716   :  { %2020 = vmatpush3.msra.mxu0 %v1868_v46 }
 0x717   :  { %2021 = vmatprep.subr.mxu0 %v3608_v54 }
 0x718   :  { %2022 = vmatpush3.msra.mxu0 %v1867_v29 }
 0x719   :  { %2023 = vmatprep.subr.mxu0 %v3608_v54 }
 0x71a   :  { %2024 = vmatpush3.msra.mxu0 %v1866_v49 }
 0x71b   :  { %2025 = vmatprep.subr.mxu0 %v3608_v54 }
 0x71c   :  { %2026 = vmatpush3.msra.mxu0 %v1865_v44 }
 0x71d   :  { %2027 = vmatprep.subr.mxu0 %v3608_v54 }
 0x71e   :  { %2028 = vmatpush3.msra.mxu0 %v1864_v59 }
 0x71f   :  { %2029 = vmatprep.subr.mxu0 %v3608_v54 }
 0x720   :  { %2030 = vmatpush3.msra.mxu0 %v1863_v56 }
 0x7c1   :  { %v1765_v53 = vpop.f32.mrf.mxu0  ;;  %v1836_v61 = vpop.f32.mrf.mxu1 }
 0x7c2   :  { %v1841_v52 = vadd.f32 %v1765_v53, %v3614_v58  ;;  %v1843_v0 = vadd.f32 %v1836_v61, %v3616_v47 }
 0x7c3   :  { %v1767_v20 = vpop.f32.mrf.mxu0  ;;  %v1838_v63 = vpop.f32.mrf.mxu1 }
 0x7c4   :  { %v1845_v62 = vmul.f32 0.5, %v1841_v52  ;;  %v1842_v38 = vadd.f32 %v1767_v20, %v3615_v11  ;;  %v1844_v57 = vadd.f32 %v1838_v63, %v3617_v55 }
 0x7c6   :  { %2115 = vtanh.f32 %v1845_v62  ;;  %v1846_v3 = vmul.f32 0.5, %v1842_v38  ;;  %v1854_v60 = vmul.f32 0.5, %v1844_v57 }
 0x7c8   :  { %2117 = vtanh.f32 %v1846_v3 }
 0x7c9   :  { %2119 = vtanh.f32 %v1843_v0 }
 0x7ca   :  { %2121 = vtanh.f32 %v1854_v60 }
 0x7d3   :  { %v2116_v1 = vpop.eup %2115 }
 0x7d4   :  { %v1849_v54 = vmul.f32 0.5, %v2116_v1 }
 0x7d5   :  { %v2118_v4 = vpop.eup %2117 }
 0x7d6   :  { %v1851_v15 = vadd.f32 0.5, %v1849_v54  ;;  %v1850_v16 = vmul.f32 0.5, %v2118_v4  ;;  %v2120_v17 = vpop.eup %2119 }
 0x7d7   :  { %v2122_v23 = vpop.eup %2121 }
 0x7d8   :  { %v1852_v18 = vadd.f32 0.5, %v1850_v16  ;;  %v1859_v19 = vmul.f32 %v2120_v17, %v1851_v15  ;;  %v1856_v24 = vmul.f32 0.5, %v2122_v23 }
 0x7da   :  { %v1858_v21 = vmul.f32 %v1852_v18, %v3303_v27  ;;  %v1857_v26 = vadd.f32 0.5, %v1856_v24 }
 0x7dc   :  { %v1860_v22 = vadd.f32 %v1859_v19, %v1858_v21 }
 0x7de   :  { %2123 = vtanh.f32 %v1860_v22 }
 0x7eb   :  { %v2124_v2 = vpop.eup %2123 }
 0x7ec   :  { %v1862_v30 = vmul.f32 %v2124_v2, %v1857_v26 }
 0x7ee   :  { %2032 = vmatmul.mubr.f32.vlgmr.msra.gmra.mxu0 %v1862_v30 }
 0x8ae   :  { %v1952_v32 = vpop.f32.mrf.mxu0 }
 0x8af   :  { %v1953_v33 = vadd.f32 %v1981_v31, %v1952_v32 }
 0x8b0   :  { %v2033_v34 = vpop.f32.mrf.mxu0 }
 0x8b1   :  { %1956 = vst [vmem:[#allocation11] sm:$0xff] %v1953_v33 }
 0x8b2   :  { %2280 = shalt.err (!%p2277_p10)
}
 0x8b3   :  { %1966 = dma.vmem_to_hbm [thread:$0]  %s1964_s21, 128, %s3339_s6, [#allocation5]  }
 0x8b4   :  { %2295 = dma.done.wait [#allocation5], 128  }
 0x8b5   :  { %2296 = vsyncadd [#allocation5], 4294967168 }
 0x8b6   :  { %1970 = vsyncpa [#allocation4], 1 }
 0x8b7   :  { %1971 = vsyncpa [#allocation7], 1 }
 0x8b8   :  { %1972 = vsyncpa [#allocation10], 1 }
 0x8b9   :  { %1973 = vsyncpa [#allocation5], 1 }

</bundles_post_ra>
